<compile_context>
chip_gen: v5e
topology: v5e:2x2
jax: 0.10.0
libtpu: 0.0.40
codegen_flags: <defaults>
</compile_context>

<pallas_src>
import functools

import jax
import jax.numpy as jnp
from jax import lax
from jax.experimental import pallas as pl
from jax.experimental.pallas import tpu as pltpu


def _attention_unit_kernel(c4, tq,
                           gamma_ref,      # SMEM (1,)      gamma scalar
                           x_ref,          # VMEM (1, C, N) current batch element
                           w_ref,          # VMEM (CF, C)   stacked [Wf; Wg; Wh]
                           b_ref,          # VMEM (CF, 1)   stacked [bf; bg; bh]
                           o_ref,          # VMEM (1, C, N)
                           fgh_scr,        # VMEM (CF, N)   relu(W @ x + b), per batch
                           acc_scr):       # VMEM (C, N)    o accumulator, per batch
    ki = pl.program_id(1)
    c = x_ref.shape[1]

    # Once per batch element: single fused projection matmul + accumulator reset.
    @pl.when(ki == 0)
    def _():
        x = x_ref[0]                                                        # (C, N)
        fgh = jnp.dot(w_ref[...], x, preferred_element_type=jnp.float32)    # (CF, N)
        fgh_scr[...] = jnp.maximum(fgh + b_ref[...], 0.0)
        acc_scr[...] = jnp.zeros_like(acc_scr)

    # Query-row tile handled by this grid step (lane-aligned dynamic slice).
    n0 = pl.multiple_of(ki * tq, tq)
    f = fgh_scr[0:c4, :]                                   # (C4, N)
    g = fgh_scr[c4:2 * c4, pl.ds(n0, tq)]                  # (C4, TQ)
    h = fgh_scr[2 * c4:2 * c4 + c, pl.ds(n0, tq)]          # (C,  TQ)

    # s[q, m] = sum_c g[c, q] * f[c, m]  -- contract dim 0 of both, no transpose.
    s = lax.dot_general(g, f, (((0,), (0,)), ((), ())),
                        preferred_element_type=jnp.float32)                 # (TQ, N)

    # Row-wise softmax (exact; rows are independent of other query tiles).
    s_max = jnp.max(s, axis=-1, keepdims=True)
    p = jnp.exp(s - s_max)
    denom = jnp.sum(p, axis=-1, keepdims=True)
    beta = p * pl.reciprocal(denom, approx=True)           # EUP vrcp, near-free

    # o[:, m] += h[:, q_tile] @ beta[q_tile, m]
    acc_scr[...] += jnp.dot(h, beta, preferred_element_type=jnp.float32)    # (C, N)

    # After the last query tile: residual + gamma scale, write the output block.
    @pl.when(ki == pl.num_programs(1) - 1)
    def _():
        gamma = gamma_ref[0]
        o_ref[0] = (gamma * acc_scr[...] + x_ref[0]).astype(o_ref.dtype)


def _pick_query_tile(n, preferred=128):
    if n <= preferred:
        return n
    for t in (preferred, 64, 32, 16, 8):
        if n % t == 0:
            return t
    return n


def attention_unit(x, params, *, tq=128):
    """x: (B, C, N) float32. params: (wf, bf, wg, bg, wh, bh, gamma)."""
    B, C, N = x.shape
    C4 = C // 4
    CF = 2 * C4 + C
    wf, bf, wg, bg, wh, bh, gamma = params

    tq = _pick_query_tile(N, tq)
    assert N % tq == 0, "N must be divisible by the query-tile size"
    nt = N // tq

    # Fuse the three 1x1-conv weights/biases into one stacked matmul operand.
    w_fused = jnp.concatenate([wf, wg, wh], axis=0)        # (CF, C)
    b_fused = jnp.concatenate([bf, bg, bh], axis=0)        # (CF, 1)

    def const_spec(shape):
        return pl.BlockSpec(shape, lambda b, k: tuple(0 for _ in shape))

    # Explicit scoped-VMEM budget: fused weights (double-buffered) + x/out blocks +
    # f/g/h + accumulator scratch + (TQ, N) softmax temporaries, with 2x headroom.
    vmem_need = 4 * (2 * CF * (C + 1) + 4 * C * N + (CF + C) * N + 4 * tq * N)
    vmem_limit = int(min(max(2 * vmem_need, 32 * 1024 * 1024), 64 * 1024 * 1024))

    kernel = functools.partial(_attention_unit_kernel, C4, tq)

    return pl.pallas_call(
        kernel,
        out_shape=jax.ShapeDtypeStruct((B, C, N), x.dtype),
        grid=(B, nt),
        in_specs=[
            pl.BlockSpec(memory_space=pltpu.MemorySpace.SMEM),     # gamma (1,)
            pl.BlockSpec((1, C, N), lambda b, k: (b, 0, 0)),       # x (same block over k)
            const_spec((CF, C)),                                   # fused weight
            const_spec((CF, 1)),                                   # fused bias
        ],
        out_specs=pl.BlockSpec((1, C, N), lambda b, k: (b, 0, 0)),
        scratch_shapes=[
            pltpu.VMEM((CF, N), jnp.float32),                      # f/g/h projections
            pltpu.VMEM((C, N), jnp.float32),                       # o accumulator
        ],
        compiler_params=pltpu.CompilerParams(
            dimension_semantics=("parallel", "arbitrary"),
            vmem_limit_bytes=vmem_limit),
    )(gamma, x, w_fused, b_fused)


def attention_unit_ref(x, params):
    """Pure-JAX reference mirroring the PyTorch forward."""
    wf, bf, wg, bg, wh, bh, gamma = params
    f = jax.nn.relu(jnp.einsum('oc,bcn->bon', wf, x) + bf[None, :, :])
    g = jax.nn.relu(jnp.einsum('oc,bcn->bon', wg, x) + bg[None, :, :])
    h = jax.nn.relu(jnp.einsum('oc,bcn->bon', wh, x) + bh[None, :, :])
    s = jnp.einsum('bcn,bcm->bnm', g, f)                 # g^T @ f
    beta = jax.nn.softmax(s, axis=-1)
    o = jnp.einsum('bcn,bnm->bcm', h, beta)              # h @ beta
    return gamma[0] * o + x


def init_params(key, in_channels):
    """Deterministic init; shapes follow attention_unit.__init__ (gamma starts at 0)."""
    C = in_channels
    C4 = C // 4
    ks = jax.random.split(key, 6)
    wf = jax.random.normal(ks[0], (C4, C), jnp.float32) * 0.05
    bf = jax.random.normal(ks[1], (C4, 1), jnp.float32) * 0.01
    wg = jax.random.normal(ks[2], (C4, C), jnp.float32) * 0.05
    bg = jax.random.normal(ks[3], (C4, 1), jnp.float32) * 0.01
    wh = jax.random.normal(ks[4], (C, C), jnp.float32) * 0.05
    bh = jax.random.normal(ks[5], (C, 1), jnp.float32) * 0.01
    gamma = jnp.zeros((1,), jnp.float32)                  # nn.Parameter(torch.zeros([1]))
    return wf, bf, wg, bg, wh, bh, gamma


if __name__ == "__main__":
    # Small, TPU-friendly shapes; N=256 exercises the multi-query-tile path (TQ=128).
    B, C, N = 2, 64, 256
    key = jax.random.PRNGKey(0)
    kx, kp = jax.random.split(key)
    x = jax.random.normal(kx, (B, C, N), jnp.float32)
    params = init_params(kp, C)

    out = jax.block_until_ready(attention_unit(x, params))

    # Sanity check vs. pure-JAX reference.  Tolerance is relaxed slightly because
    # the softmax normalization uses the approximate EUP reciprocal (~1e-3 rel).
    ref = attention_unit_ref(x, params)
    assert jnp.allclose(out, ref, atol=2e-3, rtol=2e-3)

    # Nonzero-gamma path (the gamma=0 default makes the first check trivial).
    params_g = params[:-1] + (jnp.full((1,), 0.5, jnp.float32),)
    out_g = jax.block_until_ready(attention_unit(x, params_g))
    ref_g = attention_unit_ref(x, params_g)
    assert jnp.allclose(out_g, ref_g, atol=2e-3, rtol=2e-3)

    print("KERNEL_OK")
</pallas_src>

<mosaic_0001>
module attributes {stable_mosaic.version = 11 : i64} {
  func.func @_attention_unit_kernel(%arg0: i32, %arg1: i32, %arg2: memref<1xf32, #tpu.memory_space<smem>>, %arg3: memref<1x64x256xf32, #tpu.memory_space<vmem>>, %arg4: memref<96x64xf32, #tpu.memory_space<vmem>>, %arg5: memref<96x1xf32, #tpu.memory_space<vmem>>, %arg6: memref<1x64x256xf32, #tpu.memory_space<vmem>>, %arg7: memref<96x256xf32, #tpu.memory_space<vmem>>, %arg8: memref<64x256xf32, #tpu.memory_space<vmem>>) attributes {dimension_semantics = [#tpu.dimension_semantics<parallel>, #tpu.dimension_semantics<arbitrary>], iteration_bounds = array<i64: 2, 2>, scalar_prefetch = 0 : i64, scratch_operands = 2 : i64, tpu.core_type = #tpu.core_type<tc>, window_params = [{transform_indices = @transform_0, window_bounds = array<i64: 1>}, {transform_indices = @transform_1, window_bounds = array<i64: 1, 64, 256>}, {pipeline_mode = #tpu.pipeline_mode<synchronous>, transform_indices = @transform_2, window_bounds = array<i64: 96, 64>}, {pipeline_mode = #tpu.pipeline_mode<synchronous>, transform_indices = @transform_3, window_bounds = array<i64: 96, 1>}, {transform_indices = @transform_4, window_bounds = array<i64: 1, 64, 256>}]} {
    %c0_i32 = arith.constant 0 : i32
    %0 = arith.cmpi eq, %arg1, %c0_i32 : i32
    %1 = arith.extui %0 : i1 to i32
    %c0_i32_0 = arith.constant 0 : i32
    %2 = arith.cmpi ne, %1, %c0_i32_0 : i32
    scf.if %2 {
      %c0_10 = arith.constant 0 : index
      %c0_11 = arith.constant 0 : index
      %c0_12 = arith.constant 0 : index
      %28 = vector.load %arg3[%c0_10, %c0_11, %c0_12] : memref<1x64x256xf32, #tpu.memory_space<vmem>>, vector<1x64x256xf32>
      %29 = vector.shape_cast %28 : vector<1x64x256xf32> to vector<64x256xf32>
      %c0_13 = arith.constant 0 : index
      %c0_14 = arith.constant 0 : index
      %30 = vector.load %arg4[%c0_13, %c0_14] : memref<96x64xf32, #tpu.memory_space<vmem>>, vector<96x64xf32>
      %cst_15 = arith.constant dense<0.000000e+00> : vector<96x256xf32>
      %31 = tpu.matmul %30, %29, %cst_15 {dimension_numbers = #tpu.dot_dimension_numbers<[1], [0], [0], [1], [0, 0, 1, 1], [], []>} : vector<96x64xf32>, vector<64x256xf32>, vector<96x256xf32> -> vector<96x256xf32>
      %c0_16 = arith.constant 0 : index
      %c0_17 = arith.constant 0 : index
      %32 = vector.load %arg5[%c0_16, %c0_17] : memref<96x1xf32, #tpu.memory_space<vmem>>, vector<96x1xf32>
      %33 = vector.broadcast %32 : vector<96x1xf32> to vector<96x256xf32>
      %34 = arith.addf %31, %33 : vector<96x256xf32>
      %cst_18 = arith.constant 0.000000e+00 : f32
      %35 = vector.broadcast %cst_18 : f32 to vector<96x256xf32>
      %36 = arith.maximumf %34, %35 : vector<96x256xf32>
      %c0_19 = arith.constant 0 : index
      %c0_20 = arith.constant 0 : index
      %37 = vector.load %arg7[%c0_19, %c0_20] : memref<96x256xf32, #tpu.memory_space<vmem>>, vector<96x256xf32>
      tpu.vector_store %arg7[%c0_19, %c0_20], %36 {strides = array<i32>} : memref<96x256xf32, #tpu.memory_space<vmem>>, vector<96x256xf32>,
      %cst_21 = arith.constant 0.000000e+00 : f32
      %38 = vector.broadcast %cst_21 : f32 to vector<64x256xf32>
      %c0_22 = arith.constant 0 : index
      %c0_23 = arith.constant 0 : index
      %39 = vector.load %arg8[%c0_22, %c0_23] : memref<64x256xf32, #tpu.memory_space<vmem>>, vector<64x256xf32>
      tpu.vector_store %arg8[%c0_22, %c0_23], %38 {strides = array<i32>} : memref<64x256xf32, #tpu.memory_space<vmem>>, vector<64x256xf32>,
    } else {
    }
    %c128_i32 = arith.constant 128 : i32
    %3 = arith.muli %arg1, %c128_i32 : i32
    %4 = tpu.assume_multiple %3, 128 : i32
    %c0 = arith.constant 0 : index
    %c0_1 = arith.constant 0 : index
    %5 = vector.load %arg7[%c0, %c0_1] : memref<96x256xf32, #tpu.memory_space<vmem>>, vector<16x256xf32>
    %c16 = arith.constant 16 : index
    %6 = arith.index_cast %4 : i32 to index
    %7 = vector.load %arg7[%c16, %6] : memref<96x256xf32, #tpu.memory_space<vmem>>, vector<16x128xf32>
    %c32 = arith.constant 32 : index
    %8 = arith.index_cast %4 : i32 to index
    %9 = vector.load %arg7[%c32, %8] : memref<96x256xf32, #tpu.memory_space<vmem>>, vector<64x128xf32>
    %cst = arith.constant dense<0.000000e+00> : vector<128x256xf32>
    %10 = tpu.matmul %7, %5, %cst {dimension_numbers = #tpu.dot_dimension_numbers<[0], [0], [1], [1], [0, 1, 1, 1], [], []>} : vector<16x128xf32>, vector<16x256xf32>, vector<128x256xf32> -> vector<128x256xf32>
    %cst_2 = arith.constant dense<0xFF800000> : vector<128xf32>
    %11 = vector.multi_reduction <maximumf>, %10, %cst_2 [1] : vector<128x256xf32> to vector<128xf32>
    %12 = vector.shape_cast %11 : vector<128xf32> to vector<128x1xf32>
    %13 = vector.broadcast %12 : vector<128x1xf32> to vector<128x256xf32>
    %14 = arith.subf %10, %13 : vector<128x256xf32>
    %15 = math.exp %14 : vector<128x256xf32>
    %cst_3 = arith.constant dense<0.000000e+00> : vector<128xf32>
    %16 = vector.multi_reduction <add>, %15, %cst_3 [1] : vector<128x256xf32> to vector<128xf32>
    %17 = vector.shape_cast %16 : vector<128xf32> to vector<128x1xf32>
    %18 = tpu.reciprocal %17 {approx = true} : vector<128x1xf32> -> vector<128x1xf32>
    %19 = vector.broadcast %18 : vector<128x1xf32> to vector<128x256xf32>
    %20 = arith.mulf %15, %19 : vector<128x256xf32>
    %c0_4 = arith.constant 0 : index
    %c0_5 = arith.constant 0 : index
    %21 = vector.load %arg8[%c0_4, %c0_5] : memref<64x256xf32, #tpu.memory_space<vmem>>, vector<64x256xf32>
    %cst_6 = arith.constant dense<0.000000e+00> : vector<64x256xf32>
    %22 = tpu.matmul %9, %20, %cst_6 {dimension_numbers = #tpu.dot_dimension_numbers<[1], [0], [0], [1], [0, 0, 1, 1], [], []>} : vector<64x128xf32>, vector<128x256xf32>, vector<64x256xf32> -> vector<64x256xf32>
    %23 = arith.addf %21, %22 : vector<64x256xf32>
    %c0_7 = arith.constant 0 : index
    %c0_8 = arith.constant 0 : index
    %24 = vector.load %arg8[%c0_7, %c0_8] : memref<64x256xf32, #tpu.memory_space<vmem>>, vector<64x256xf32>
    tpu.vector_store %arg8[%c0_7, %c0_8], %23 {strides = array<i32>} : memref<64x256xf32, #tpu.memory_space<vmem>>, vector<64x256xf32>,
    %c1_i32 = arith.constant 1 : i32
    %25 = arith.cmpi eq, %arg1, %c1_i32 : i32
    %26 = arith.extui %25 : i1 to i32
    %c0_i32_9 = arith.constant 0 : i32
    %27 = arith.cmpi ne, %26, %c0_i32_9 : i32
    scf.if %27 {
      %c0_10 = arith.constant 0 : index
      %28 = memref.load %arg2[%c0_10] : memref<1xf32, #tpu.memory_space<smem>>
      %c0_11 = arith.constant 0 : index
      %c0_12 = arith.constant 0 : index
      %29 = vector.load %arg8[%c0_11, %c0_12] : memref<64x256xf32, #tpu.memory_space<vmem>>, vector<64x256xf32>
      %30 = vector.broadcast %28 : f32 to vector<64x256xf32>
      %31 = arith.mulf %30, %29 : vector<64x256xf32>
      %c0_13 = arith.constant 0 : index
      %c0_14 = arith.constant 0 : index
      %c0_15 = arith.constant 0 : index
      %32 = vector.load %arg3[%c0_13, %c0_14, %c0_15] : memref<1x64x256xf32, #tpu.memory_space<vmem>>, vector<1x64x256xf32>
      %33 = vector.shape_cast %32 : vector<1x64x256xf32> to vector<64x256xf32>
      %34 = arith.addf %31, %33 : vector<64x256xf32>
      %c0_16 = arith.constant 0 : index
      %c0_17 = arith.constant 0 : index
      %c0_18 = arith.constant 0 : index
      %35 = vector.load %arg6[%c0_16, %c0_17, %c0_18] : memref<1x64x256xf32, #tpu.memory_space<vmem>>, vector<1x64x256xf32>
      %36 = vector.shape_cast %35 : vector<1x64x256xf32> to vector<64x256xf32>
      %37 = vector.shape_cast %34 : vector<64x256xf32> to vector<1x64x256xf32>
      tpu.vector_store %arg6[%c0_16, %c0_17, %c0_18], %37 {strides = array<i32>} : memref<1x64x256xf32, #tpu.memory_space<vmem>>, vector<1x64x256xf32>,
    } else {
    }
    return
  }
  func.func @transform_0(%arg0: i32, %arg1: i32) -> i32 {
    %c0_i32 = arith.constant 0 : i32
    %c0_i32_0 = arith.constant 0 : i32
    return %c0_i32 : i32
  }
  func.func @transform_1(%arg0: i32, %arg1: i32) -> (i32, i32, i32) {
    %c0_i32 = arith.constant 0 : i32
    %c0_i32_0 = arith.constant 0 : i32
    %c0_i32_1 = arith.constant 0 : i32
    return %arg0, %c0_i32, %c0_i32_0 : i32, i32, i32
  }
  func.func @transform_2(%arg0: i32, %arg1: i32) -> (i32, i32) {
    %c0_i32 = arith.constant 0 : i32
    %c0_i32_0 = arith.constant 0 : i32
    %c0_i32_1 = arith.constant 0 : i32
    return %c0_i32, %c0_i32_0 : i32, i32
  }
  func.func @transform_3(%arg0: i32, %arg1: i32) -> (i32, i32) {
    %c0_i32 = arith.constant 0 : i32
    %c0_i32_0 = arith.constant 0 : i32
    %c0_i32_1 = arith.constant 0 : i32
    return %c0_i32, %c0_i32_0 : i32, i32
  }
  func.func @transform_4(%arg0: i32, %arg1: i32) -> (i32, i32, i32) {
    %c0_i32 = arith.constant 0 : i32
    %c0_i32_0 = arith.constant 0 : i32
    %c0_i32_1 = arith.constant 0 : i32
    return %arg0, %c0_i32, %c0_i32_0 : i32, i32, i32
  }
}

</mosaic_0001>

<bundles_post_ra>
// kernel: tpu_custom_call.1
= control target key start
LH: loop header
LB: loop body
LE: loop exit
PB: predicated region body
PF: predicated region fallthrough
CT: control target
= control target key end

     0   :  { %s2280_s0 = inlined_call_operand.<no memory space> [shape: f32[1], index: 0, kind: input, shape index: {}]   ;;  %s2281_s1 = inlined_call_operand.vmem [shape: f32[2,64,256], index: 1, kind: input, shape index: {}]   ;;  %s2282_s2 = inlined_call_operand.vmem [shape: f32[96,64], index: 2, kind: input, shape index: {}]   ;;  %s2283_s3 = inlined_call_operand.vmem [shape: f32[96,1], index: 3, kind: input, shape index: {}]   ;;  %s2284_s4 = inlined_call_operand.hbm [shape: f32[2,64,256], index: 4, kind: output, shape index: {}]  }
   0x1   :  { %9 = sst [smem:[#allocation4]] %s2280_s0 }
   0x2   :  { %10 = vsyncpa [#allocation6], 0 }
   0x3   :  { %12 = vsyncpa [#allocation6 + $0x1], 0  ;;  %s1691_s17 = smov 0   ;;  %s1693_s18 = smov 0  }
   0x4   :  { %s1695_s19 = smov 0   ;;  %s1697_s20 = smov 0  }
   0x5   :  { %s1699_s21 = smov 0   ;;  %s1701_s22 = smov 0  }
   0x6   :  { %s1703_s23 = smov 0   ;;  %s1705_s24 = smov 0  }
   0x7 LB: > { %s1297_s0 = sadd.s32 4294967295, %s1657_s24   ;;  %s1298_s25 = sadd.s32 4294967294, %s1657_s24   ;;  %s1657_s24 = sphi %s1705_s24, %s18_s24   ;;  %s1653_s23 = sphi %s1703_s23, %s2293_s23   ;;  %s1649_s22 = sphi %s1701_s22, %s2292_s22   ;;  %s1645_s21 = sphi %s1699_s21, %s2291_s21   ;;  %s1641_s20 = sphi %s1697_s20, %s2290_s20   ;;  %s1637_s19 = sphi %s1695_s19, %s2289_s19   ;;  %s1633_s18 = sphi %s1693_s18, %s2288_s18   ;;  %s1629_s17 = sphi %s1691_s17, %s2287_s17  }
   0x8   : > { %s27_s26 = sadd.s32 1, %s1649_s22  ;;  %s30_s27 = sadd.s32 1, %s1653_s23 }
   0x9   : > { %p28_p0 = scmp.ge.s32.totalorder %s27_s26, 2  ;;  %p136_p1 = scmp.ne.s32.totalorder %s1637_s19, %s1633_s18 }
   0xa   : > { %p137_p2 = scmp.eq.s32.totalorder %s1297_s0, 3  ;;  %p142_p4 = scmp.ne.s32.totalorder %s1633_s18, %s1629_s17 }
   0xb   : > { %s2295_s26 = smov (%p28_p0, %s27_s26), 0  ;;  %s2297_s27 = smov (!%p28_p0, %s30_s27), %s1653_s23 }
   0xc   : > { %p1740_p3 = por %p137_p2, %p136_p1  ;;  %p32_p5 = scmp.ge.s32.totalorder %s2297_s27, 2 }
   0xd   : > { %p143_p6 = scmp.eq.s32.totalorder %s1298_s25, 3  ;;  %p1301_p7 = scmp.ge.s32.totalorder %s1657_s24, 1 }
   0xe   : > { %p178_p8 = scmp.lt.s32.totalorder %s1657_s24, 5  ;;  %s2299_s27 = smov (%p32_p5, %s2297_s27), 0 }
   0xf   : > { %p1750_p9 = por %p143_p6, %p142_p4  ;;  %s123_s30 = ssub.s32 %s1653_s23, %s2299_s27 }
  0x10   : > { %p179_p10 = pnand %p1301_p7, %p178_p8  ;;  %s126_s5 = sadd.s32 1, %s1637_s19 }
  0x11   : > { %p124_p11 = scmp.eq.s32.totalorder %s123_s30, 0  ;;  %s201_s7 = sand.u32 (!%p179_p10), 1, %s1633_s18  }
  0x12   : > { %182 = sbr.rel (%p179_p10) target bundleno = 1164 (0x48c), region = 36  ;;  %p204_p12 = scmp.lt.s32.totalorder (!%p179_p10), %s1645_s21, 1 }
  0x13   : > { %s1758_s6 = scalar_select %p124_p11, %s1637_s19, %s126_s5  }
  0x14   : > { %s1302_s8 = sshll.u32 (!%p179_p10), %s201_s7, 7  ;;  %p1305_p13 = scmp.ne.s32.totalorder (!%p179_p10), %s1641_s20, 0 }
  0x15   : > { %s1770_s14 = scalar_lea.vmem (!%p179_p10), [#allocation5], %s1302_s8 }
  0x17   : > { %s205_s9 = scalar_select %p204_p12, %s1645_s21, 1 }
  0x18   : > { %212 = sbr.rel (%p1305_p13) target bundleno = 225 (0xe1), region = 40 }
  0x19   : > { %s1370_s10 = sshll.u32 %s205_s9, 7 }
  0x1a   : > { %s1768_s13 = scalar_lea.vmem %s2281_s1, %s1370_s10 }
  0x1d   : > { %v227_v0 = vld [vmem:[%s1768_s13 + $0x70] sm:$0xff]  ;;  %v228_v1 = vld [vmem:[%s1768_s13 + $0x78] sm:$0xff]  ;;  %v225_v2 = vld [vmem:[%s1768_s13 + $0x60] sm:$0xff]  ;;  %vm313_vm0 = vcmask 523264   ;;  %v1659_v19 = vmov 0  }
  0x1e   : > { %358 = vmatpush.msra.mxu0 %v227_v0  ;;  %1372 = vmatpush.msra.mxu2 %v227_v0  ;;  %v226_v3 = vld [vmem:[%s1768_s13 + $0x68] sm:$0xff]  ;;  %v223_v4 = vld [vmem:[%s1768_s13 + $0x50] sm:$0xff]  ;;  %v224_v5 = vld [vmem:[%s1768_s13 + $0x58] sm:$0xff] }
  0x1f   : > { %411 = vmatpush.msra.mxu1 %v228_v1  ;;  %1380 = vmatpush.msra.mxu3 %v228_v1  ;;  %v221_v6 = vld [vmem:[%s1768_s13 + $0x40] sm:$0xff]  ;;  %v222_v7 = vld [vmem:[%s1768_s13 + $0x48] sm:$0xff]  ;;  %v219_v8 = vld [vmem:[%s1768_s13 + $0x30] sm:$0xff] }
  0x20   : > { %359 = vmatpush.msra.mxu0 %v225_v2  ;;  %1373 = vmatpush.msra.mxu2 %v225_v2  ;;  %v220_v9 = vld [vmem:[%s1768_s13 + $0x38] sm:$0xff]  ;;  %v217_v10 = vld [vmem:[%s1768_s13 + $0x20] sm:$0xff]  ;;  %v218_v11 = vld [vmem:[%s1768_s13 + $0x28] sm:$0xff] }
  0x21   : > { %412 = vmatpush.msra.mxu1 %v226_v3  ;;  %1381 = vmatpush.msra.mxu3 %v226_v3  ;;  %v215_v12 = vld [vmem:[%s1768_s13 + $0x10] sm:$0xff]  ;;  %v216_v13 = vld [vmem:[%s1768_s13 + $0x18] sm:$0xff]  ;;  %v213_v14 = vld [vmem:[%s1768_s13] sm:$0xff] }
  0x22   : > { %360 = vmatpush.msra.mxu0 %v223_v4  ;;  %1374 = vmatpush.msra.mxu2 %v223_v4  ;;  %v214_v15 = vld [vmem:[%s1768_s13 + $0x8] sm:$0xff]  ;;  %v229_v16 = vld [vmem:[%s2282_s2] sm:$0xff]  ;;  %v235_v17 = vld [vmem:[%s2282_s2 + $0x30] sm:$0xff] }
  0x23   : > { %413 = vmatpush.msra.mxu1 %v224_v5  ;;  %1382 = vmatpush.msra.mxu3 %v224_v5  ;;  %v241_v18 = vld [vmem:[%s2283_s3] sm:$0xff]  ;;  %v243_v20 = vld [vmem:[%s2283_s3 + $0x10] sm:$0xff]  ;;  %v230_v22 = vld [vmem:[%s2282_s2 + $0x8] sm:$0xff] }
  0x24   : > { %361 = vmatpush.msra.mxu0 %v221_v6  ;;  %1375 = vmatpush.msra.mxu2 %v221_v6  ;;  %v245_v21 = vld [vmem:[%s2283_s3 + $0x20] sm:$0xff]  ;;  %v236_v23 = vld [vmem:[%s2282_s2 + $0x38] sm:$0xff]  ;;  %v242_v24 = vld [vmem:[%s2283_s3 + $0x8] sm:$0xff] }
  0x25   : > { %414 = vmatpush.msra.mxu1 %v222_v7  ;;  %1383 = vmatpush.msra.mxu3 %v222_v7  ;;  %v244_v25 = vld [vmem:[%s2283_s3 + $0x18] sm:$0xff]  ;;  %v246_v26 = vld [vmem:[%s2283_s3 + $0x28] sm:$0xff]  ;;  %v231_v27 = vld [vmem:[%s2282_s2 + $0x10] sm:$0xff] }
  0x26   : > { %362 = vmatpush.msra.mxu0 %v219_v8  ;;  %1376 = vmatpush.msra.mxu2 %v219_v8  ;;  %v237_v28 = vld [vmem:[%s2282_s2 + $0x40] sm:$0xff]  ;;  %v247_v29 = vld [vmem:[%s2283_s3 + $0x30] sm:$0xff]  ;;  %v248_v30 = vld [vmem:[%s2283_s3 + $0x38] sm:$0xff] }
  0x27   : > { %415 = vmatpush.msra.mxu1 %v220_v9  ;;  %1384 = vmatpush.msra.mxu3 %v220_v9  ;;  %v249_v31 = vld [vmem:[%s2283_s3 + $0x40] sm:$0xff]  ;;  %v232_v32 = vld [vmem:[%s2282_s2 + $0x18] sm:$0xff]  ;;  %v238_v33 = vld [vmem:[%s2282_s2 + $0x48] sm:$0xff] }
  0x28   : > { %363 = vmatpush.msra.mxu0 %v217_v10  ;;  %1377 = vmatpush.msra.mxu2 %v217_v10  ;;  %v250_v34 = vld [vmem:[%s2283_s3 + $0x48] sm:$0xff]  ;;  %v251_v35 = vld [vmem:[%s2283_s3 + $0x50] sm:$0xff]  ;;  %v252_v36 = vld [vmem:[%s2283_s3 + $0x58] sm:$0xff] }
  0x29   : > { %416 = vmatpush.msra.mxu1 %v218_v11  ;;  %1385 = vmatpush.msra.mxu3 %v218_v11  ;;  %v233_v37 = vld [vmem:[%s2282_s2 + $0x20] sm:$0xff]  ;;  %v239_v38 = vld [vmem:[%s2282_s2 + $0x50] sm:$0xff]  ;;  %v234_v39 = vld [vmem:[%s2282_s2 + $0x28] sm:$0xff] }
  0x2a   : > { %364 = vmatpush.msra.mxu0 %v215_v12  ;;  %1378 = vmatpush.msra.mxu2 %v215_v12  ;;  %v240_v40 = vld [vmem:[%s2282_s2 + $0x58] sm:$0xff] }
  0x2b   : > { %417 = vmatpush.msra.mxu1 %v216_v13  ;;  %1386 = vmatpush.msra.mxu3 %v216_v13 }
  0x2c   : > { %365 = vmatpush.msra.mxu0 %v213_v14  ;;  %1379 = vmatpush.msra.mxu2 %v213_v14 }
  0x2d   : > { %418 = vmatpush.msra.mxu1 %v214_v15  ;;  %1387 = vmatpush.msra.mxu3 %v214_v15 }
  0x2e   : > { %1464 = vset.pattern.permute.xlu0 %v1659_v19  ;;  %1306 = vmatmul.msk.f32.vlgmr.msra.gmra.mxu0 %vm313_vm0, %v229_v16 }
  0x2f   : > { %1312 = vmatmul.msk.f32.vlgmr.msra.gmra.mxu2 %vm313_vm0, %v235_v17  ;;  %1318 = vmatmul.msk.f32.vlgmr.msra.gmra.mxu1 %vm313_vm0, %v229_v16 }
  0x30   : > { %1324 = vmatmul.msk.f32.vlgmr.msra.gmra.mxu3 %vm313_vm0, %v235_v17  ;;  %255 = vperm.xlu0 %1464, %v241_v18  }
  0x31   : > { %1465 = vset.pattern.permute.xlu1 %v1659_v19  ;;  %1466 = vset.pattern.permute.xlu2 %v1659_v19 }
  0x32   : > { %265 = vperm.xlu1 %1465, %v243_v20   ;;  %275 = vperm.xlu2 %1466, %v245_v21   ;;  %v1660_v20 = vmov 0.0  }
  0x33   : > { %504 = vst [vmem:[#allocation3 + $0x30] sm:$0xff] %v1660_v20 }
  0x34   : > { %505 = vst [vmem:[#allocation3] sm:$0xff] %v1660_v20 }
  0x35   : > { %506 = vst [vmem:[#allocation3 + $0x58] sm:$0xff] %v1660_v20 }
  0x36   : > { %1307 = vmatmul.msk.f32.gmra.mxu0 %vm313_vm0, %v230_v22  ;;  %507 = vst [vmem:[#allocation3 + $0x18] sm:$0xff] %v1660_v20 }
  0x37   : > { %1313 = vmatmul.msk.f32.gmra.mxu2 %vm313_vm0, %v236_v23  ;;  %1319 = vmatmul.msk.f32.gmra.mxu1 %vm313_vm0, %v230_v22  ;;  %508 = vst [vmem:[#allocation3 + $0x50] sm:$0xff] %v1660_v20 }
  0x38   : > { %1325 = vmatmul.msk.f32.gmra.mxu3 %vm313_vm0, %v236_v23  ;;  %260 = vperm.xlu0 %1464, %v242_v24   ;;  %509 = vst [vmem:[#allocation3 + $0x68] sm:$0xff] %v1660_v20 }
  0x39   : > { %510 = vst [vmem:[#allocation3 + $0x8] sm:$0xff] %v1660_v20 }
  0x3a   : > { %270 = vperm.xlu1 %1465, %v244_v25   ;;  %280 = vperm.xlu2 %1466, %v246_v26   ;;  %511 = vst [vmem:[#allocation3 + $0x48] sm:$0xff] %v1660_v20 }
  0x3b   : > { %512 = vst [vmem:[#allocation3 + $0x40] sm:$0xff] %v1660_v20 }
  0x3c   : > { %513 = vst [vmem:[#allocation3 + $0x20] sm:$0xff] %v1660_v20 }
  0x3d   : > { %514 = vst [vmem:[#allocation3 + $0x10] sm:$0xff] %v1660_v20 }
  0x3e   : > { %1308 = vmatmul.msk.f32.gmra.mxu0 %vm313_vm0, %v231_v27  ;;  %515 = vst [vmem:[#allocation3 + $0x38] sm:$0xff] %v1660_v20 }
  0x3f   : > { %1314 = vmatmul.msk.f32.gmra.mxu2 %vm313_vm0, %v237_v28  ;;  %1320 = vmatmul.msk.f32.gmra.mxu1 %vm313_vm0, %v231_v27  ;;  %516 = vst [vmem:[#allocation3 + $0x60] sm:$0xff] %v1660_v20 }
  0x40   : > { %1326 = vmatmul.msk.f32.gmra.mxu3 %vm313_vm0, %v237_v28  ;;  %285 = vperm.xlu0 %1464, %v247_v29   ;;  %517 = vst [vmem:[#allocation3 + $0x70] sm:$0xff] %v1660_v20 }
  0x41   : > { %518 = vst [vmem:[#allocation3 + $0x78] sm:$0xff] %v1660_v20 }
  0x42   : > { %290 = vperm.xlu1 %1465, %v248_v30   ;;  %295 = vperm.xlu2 %1466, %v249_v31   ;;  %519 = vst [vmem:[#allocation3 + $0x28] sm:$0xff] %v1660_v20 }
  0x46   : > { %1309 = vmatmul.msk.f32.gmra.mxu0 %vm313_vm0, %v232_v32 }
  0x47   : > { %1315 = vmatmul.msk.f32.gmra.mxu2 %vm313_vm0, %v238_v33  ;;  %1321 = vmatmul.msk.f32.gmra.mxu1 %vm313_vm0, %v232_v32 }
  0x48   : > { %1327 = vmatmul.msk.f32.gmra.mxu3 %vm313_vm0, %v238_v33  ;;  %300 = vperm.xlu0 %1464, %v250_v34  }
  0x4a   : > { %305 = vperm.xlu1 %1465, %v251_v35   ;;  %310 = vperm.xlu2 %1466, %v252_v36  }
  0x4e   : > { %1310 = vmatmul.msk.f32.gmra.mxu0 %vm313_vm0, %v233_v37 }
  0x4f   : > { %1316 = vmatmul.msk.f32.gmra.mxu2 %vm313_vm0, %v239_v38  ;;  %1322 = vmatmul.msk.f32.gmra.mxu1 %vm313_vm0, %v233_v37 }
  0x50   : > { %1328 = vmatmul.msk.f32.gmra.mxu3 %vm313_vm0, %v239_v38 }
  0x56   : > { %1311 = vmatmul.msk.f32.gmra.mxu0 %vm313_vm0, %v234_v39 }
  0x57   : > { %1317 = vmatmul.msk.f32.gmra.mxu2 %vm313_vm0, %v240_v40  ;;  %1323 = vmatmul.msk.f32.gmra.mxu1 %vm313_vm0, %v234_v39 }
  0x58   : > { %1329 = vmatmul.msk.f32.gmra.mxu3 %vm313_vm0, %v240_v40 }
  0x8c   : > { %v1885_v48 = vpop.permute.xlu2 %275 }
  0x94   : > { %v1887_v1 = vpop.permute.xlu2 %280 }
  0x9c   : > { %v296_v15 = vpop.permute.xlu2 %295 }
  0xa2   : > { %v256_v41 = vpop.permute.xlu0 %255 }
  0xa4   : > { %v266_v42 = vpop.permute.xlu1 %265 }
  0xaa   : > { %v261_v43 = vpop.permute.xlu0 %260 }
  0xab   : > { %v367_v44 = vpop.f32.mrf.mxu0 }
  0xac   : > { %v368_v45 = vadd.f32 %v367_v44, %v256_v41  ;;  %v420_v46 = vpop.f32.mrf.mxu1  ;;  %v271_v50 = vpop.permute.xlu1 %270 }
  0xad   : > { %v421_v47 = vadd.f32 %v420_v46, %v256_v41 }
  0xae   : > { %v456_v49 = vmax.f32 %v368_v45, 0.0 }
  0xaf   : > { %v457_v51 = vmax.f32 %v421_v47, 0.0 }
  0xb0   : > { %480 = vst [vmem:[#allocation2] sm:$0xff] %v456_v49 }
  0xb1   : > { %481 = vst [vmem:[#allocation2 + $0x8] sm:$0xff] %v457_v51 }
  0xb2   : > { %v286_v52 = vpop.permute.xlu0 %285  ;;  %v385_v53 = vpop.f32.mrf.mxu2 }
  0xb3   : > { %v386_v54 = vadd.f32 %v385_v53, %v286_v52  ;;  %v438_v55 = vpop.f32.mrf.mxu3  ;;  %v370_v56 = vpop.f32.mrf.mxu0 }
  0xb4   : > { %v439_v57 = vadd.f32 %v438_v55, %v286_v52  ;;  %v371_v58 = vadd.f32 %v370_v56, %v261_v43  ;;  %v423_v59 = vpop.f32.mrf.mxu1  ;;  %v291_v2 = vpop.permute.xlu1 %290 }
  0xb5   : > { %v468_v60 = vmax.f32 %v386_v54, 0.0  ;;  %v424_v61 = vadd.f32 %v423_v59, %v261_v43  ;;  %v311_v55 = vpop.permute.xlu2 %310 }
  0xb6   : > { %v469_v62 = vmax.f32 %v439_v57, 0.0  ;;  %v458_v63 = vmax.f32 %v371_v58, 0.0 }
  0xb7   : > { %492 = vst [vmem:[#allocation2 + $0x60] sm:$0xff] %v468_v60  ;;  %v459_v0 = vmax.f32 %v424_v61, 0.0 }
  0xb8   : > { %493 = vst [vmem:[#allocation2 + $0x68] sm:$0xff] %v469_v62 }
  0xb9   : > { %482 = vst [vmem:[#allocation2 + $0x10] sm:$0xff] %v458_v63 }
  0xba   : > { %483 = vst [vmem:[#allocation2 + $0x18] sm:$0xff] %v459_v0  ;;  %v388_v3 = vpop.f32.mrf.mxu2  ;;  %v301_v29 = vpop.permute.xlu0 %300 }
  0xbb   : > { %v389_v4 = vadd.f32 %v388_v3, %v291_v2  ;;  %v441_v5 = vpop.f32.mrf.mxu3  ;;  %v373_v6 = vpop.f32.mrf.mxu0 }
  0xbc   : > { %v442_v7 = vadd.f32 %v441_v5, %v291_v2  ;;  %v374_v8 = vadd.f32 %v373_v6, %v266_v42  ;;  %v426_v9 = vpop.f32.mrf.mxu1 }
  0xbd   : > { %v470_v10 = vmax.f32 %v389_v4, 0.0  ;;  %v427_v11 = vadd.f32 %v426_v9, %v266_v42  ;;  %v306_v42 = vpop.permute.xlu1 %305 }
  0xbe   : > { %v471_v12 = vmax.f32 %v442_v7, 0.0  ;;  %v460_v13 = vmax.f32 %v374_v8, 0.0 }
  0xbf   : > { %494 = vst [vmem:[#allocation2 + $0x70] sm:$0xff] %v470_v10  ;;  %v461_v14 = vmax.f32 %v427_v11, 0.0 }
  0xc0   : > { %495 = vst [vmem:[#allocation2 + $0x78] sm:$0xff] %v471_v12 }
  0xc1   : > { %484 = vst [vmem:[#allocation2 + $0x20] sm:$0xff] %v460_v13 }
  0xc2   : > { %485 = vst [vmem:[#allocation2 + $0x28] sm:$0xff] %v461_v14  ;;  %v391_v16 = vpop.f32.mrf.mxu2 }
  0xc3   : > { %v392_v17 = vadd.f32 %v391_v16, %v296_v15  ;;  %v444_v18 = vpop.f32.mrf.mxu3  ;;  %v376_v19 = vpop.f32.mrf.mxu0 }
  0xc4   : > { %v445_v21 = vadd.f32 %v444_v18, %v296_v15  ;;  %v377_v22 = vadd.f32 %v376_v19, %v271_v50  ;;  %v429_v23 = vpop.f32.mrf.mxu1 }
  0xc5   : > { %v472_v24 = vmax.f32 %v392_v17, 0.0  ;;  %v430_v25 = vadd.f32 %v429_v23, %v271_v50 }
  0xc6   : > { %v473_v26 = vmax.f32 %v445_v21, 0.0  ;;  %v462_v27 = vmax.f32 %v377_v22, 0.0 }
  0xc7   : > { %496 = vst [vmem:[#allocation2 + $0x80] sm:$0xff] %v472_v24  ;;  %v463_v28 = vmax.f32 %v430_v25, 0.0 }
  0xc8   : > { %497 = vst [vmem:[#allocation2 + $0x88] sm:$0xff] %v473_v26 }
  0xc9   : > { %486 = vst [vmem:[#allocation2 + $0x30] sm:$0xff] %v462_v27 }
  0xca   : > { %487 = vst [vmem:[#allocation2 + $0x38] sm:$0xff] %v463_v28  ;;  %v394_v30 = vpop.f32.mrf.mxu2 }
  0xcb   : > { %v395_v31 = vadd.f32 %v394_v30, %v301_v29  ;;  %v447_v32 = vpop.f32.mrf.mxu3  ;;  %v379_v33 = vpop.f32.mrf.mxu0 }
  0xcc   : > { %v448_v34 = vadd.f32 %v447_v32, %v301_v29  ;;  %v380_v35 = vadd.f32 %v379_v33, %v1885_v48  ;;  %v432_v36 = vpop.f32.mrf.mxu1 }
  0xcd   : > { %v474_v37 = vmax.f32 %v395_v31, 0.0  ;;  %v433_v38 = vadd.f32 %v432_v36, %v1885_v48 }
  0xce   : > { %v475_v39 = vmax.f32 %v448_v34, 0.0  ;;  %v464_v40 = vmax.f32 %v380_v35, 0.0 }
  0xcf   : > { %498 = vst [vmem:[#allocation2 + $0x90] sm:$0xff] %v474_v37  ;;  %v465_v41 = vmax.f32 %v433_v38, 0.0 }
  0xd0   : > { %499 = vst [vmem:[#allocation2 + $0x98] sm:$0xff] %v475_v39 }
  0xd1   : > { %488 = vst [vmem:[#allocation2 + $0x40] sm:$0xff] %v464_v40 }
  0xd2   : > { %489 = vst [vmem:[#allocation2 + $0x48] sm:$0xff] %v465_v41  ;;  %v397_v43 = vpop.f32.mrf.mxu2 }
  0xd3   : > { %v398_v44 = vadd.f32 %v397_v43, %v306_v42  ;;  %v450_v45 = vpop.f32.mrf.mxu3  ;;  %v382_v46 = vpop.f32.mrf.mxu0 }
  0xd4   : > { %v451_v47 = vadd.f32 %v450_v45, %v306_v42  ;;  %v383_v48 = vadd.f32 %v382_v46, %v1887_v1  ;;  %v435_v49 = vpop.f32.mrf.mxu1 }
  0xd5   : > { %v476_v50 = vmax.f32 %v398_v44, 0.0  ;;  %v436_v51 = vadd.f32 %v435_v49, %v1887_v1 }
  0xd6   : > { %v477_v52 = vmax.f32 %v451_v47, 0.0  ;;  %v466_v53 = vmax.f32 %v383_v48, 0.0 }
  0xd7   : > { %500 = vst [vmem:[#allocation2 + $0xa0] sm:$0xff] %v476_v50  ;;  %v467_v54 = vmax.f32 %v436_v51, 0.0 }
  0xd8   : > { %501 = vst [vmem:[#allocation2 + $0xa8] sm:$0xff] %v477_v52 }
  0xd9   : > { %490 = vst [vmem:[#allocation2 + $0x50] sm:$0xff] %v466_v53 }
  0xda   : > { %491 = vst [vmem:[#allocation2 + $0x58] sm:$0xff] %v467_v54  ;;  %v400_v56 = vpop.f32.mrf.mxu2 }
  0xdb   : > { %v401_v57 = vadd.f32 %v400_v56, %v311_v55  ;;  %v453_v58 = vpop.f32.mrf.mxu3 }
  0xdc   : > { %v454_v59 = vadd.f32 %v453_v58, %v311_v55 }
  0xdd   : > { %v478_v60 = vmax.f32 %v401_v57, 0.0 }
  0xde   : > { %v479_v61 = vmax.f32 %v454_v59, 0.0 }
  0xdf   : > { %502 = vst [vmem:[#allocation2 + $0xb0] sm:$0xff] %v478_v60 }
  0xe0   : > { %503 = vst [vmem:[#allocation2 + $0xb8] sm:$0xff] %v479_v61 }
  0xe1 PF: > { %s1330_s30 = sshll.u32 %s1641_s20, 7  ;;  %v523_v62 = vld [vmem:[#allocation2 + $0x10] sm:$0xff]  ;;  %v524_v63 = vld [vmem:[#allocation2 + $0x18] sm:$0xff]  ;;  %v521_v0 = vld [vmem:[#allocation2] sm:$0xff]  ;;  %vm571_vm1 = vcmask 130048   ;;  %p1364_p0 = scmp.ne.s32.totalorder %s1641_s20, 1 }
  0xe2   : > { %s525_s5 = sshra.s32 %s1330_s30, 7  ;;  %634 = vmatpush.msra.mxu0 %v523_v62  ;;  %699 = vmatpush.msra.mxu1 %v524_v63  ;;  %v522_v1 = vld [vmem:[#allocation2 + $0x8] sm:$0xff]  ;;  %s1124_s10 = sld [smem:[#allocation4]] (!%p1364_p0) }
  0xe3   : > { %s1331_s8 = sshll.u32 %s525_s5, 3 }
  0xe4   : > { %635 = vmatpush.msra.mxu0 %v521_v0  ;;  %700 = vmatpush.msra.mxu1 %v522_v1  ;;  %s1910_s9 = scalar_lea.vmem [#allocation2], %s1331_s8 }
  0xe7   : > { %v529_v2 = vld [vmem:[%s1910_s9 + $0x20] sm:$0xff]  ;;  %v530_v3 = vld [vmem:[%s1910_s9 + $0x30] sm:$0xff] }
  0xe8   : > { %539 = vxpose.xlu0.b32.start [1/2] (short) %v529_v2, 128 }
  0xf0   : > { %540 = vxpose.xlu0.b32.end [2/2] (short) %v530_v3, 128 }
 0x18c   : > { %v555_v4 = vpop.trf.xlu0 }
 0x18d   : > { %1332 = vmatmul.msk.f32.vlgmr.msra.gmra.mxu0 %vm571_vm1, %v555_v4  ;;  %1348 = vmatmul.msk.f32.vlgmr.msra.gmra.mxu1 %vm571_vm1, %v555_v4 }
 0x194   : > { %v556_v5 = vpop.trf.xlu0 }
 0x195   : > { %1333 = vmatmul.msk.f32.gmra.mxu0 %vm571_vm1, %v556_v5  ;;  %1349 = vmatmul.msk.f32.gmra.mxu1 %vm571_vm1, %v556_v5 }
 0x19c   : > { %v557_v6 = vpop.trf.xlu0 }
 0x19d   : > { %1334 = vmatmul.msk.f32.gmra.mxu0 %vm571_vm1, %v557_v6  ;;  %1350 = vmatmul.msk.f32.gmra.mxu1 %vm571_vm1, %v557_v6 }
 0x1a4   : > { %v558_v7 = vpop.trf.xlu0 }
 0x1a5   : > { %1335 = vmatmul.msk.f32.gmra.mxu0 %vm571_vm1, %v558_v7  ;;  %1351 = vmatmul.msk.f32.gmra.mxu1 %vm571_vm1, %v558_v7 }
 0x1ac   : > { %v559_v8 = vpop.trf.xlu0 }
 0x1ad   : > { %1336 = vmatmul.msk.f32.gmra.mxu0 %vm571_vm1, %v559_v8  ;;  %1352 = vmatmul.msk.f32.gmra.mxu1 %vm571_vm1, %v559_v8 }
 0x1b4   : > { %v560_v9 = vpop.trf.xlu0 }
 0x1b5   : > { %1337 = vmatmul.msk.f32.gmra.mxu0 %vm571_vm1, %v560_v9  ;;  %1353 = vmatmul.msk.f32.gmra.mxu1 %vm571_vm1, %v560_v9 }
 0x1bc   : > { %v561_v10 = vpop.trf.xlu0 }
 0x1bd   : > { %1338 = vmatmul.msk.f32.gmra.mxu0 %vm571_vm1, %v561_v10  ;;  %1354 = vmatmul.msk.f32.gmra.mxu1 %vm571_vm1, %v561_v10 }
 0x1c4   : > { %v562_v11 = vpop.trf.xlu0 }
 0x1c5   : > { %1339 = vmatmul.msk.f32.gmra.mxu0 %vm571_vm1, %v562_v11  ;;  %1355 = vmatmul.msk.f32.gmra.mxu1 %vm571_vm1, %v562_v11 }
 0x1cc   : > { %v563_v12 = vpop.trf.xlu0 }
 0x1cd   : > { %1340 = vmatmul.msk.f32.gmra.mxu0 %vm571_vm1, %v563_v12  ;;  %1356 = vmatmul.msk.f32.gmra.mxu1 %vm571_vm1, %v563_v12 }
 0x1d4   : > { %v564_v13 = vpop.trf.xlu0 }
 0x1d5   : > { %1341 = vmatmul.msk.f32.gmra.mxu0 %vm571_vm1, %v564_v13  ;;  %1357 = vmatmul.msk.f32.gmra.mxu1 %vm571_vm1, %v564_v13 }
 0x1dc   : > { %v565_v14 = vpop.trf.xlu0 }
 0x1dd   : > { %1342 = vmatmul.msk.f32.gmra.mxu0 %vm571_vm1, %v565_v14  ;;  %1358 = vmatmul.msk.f32.gmra.mxu1 %vm571_vm1, %v565_v14 }
 0x1e4   : > { %v566_v15 = vpop.trf.xlu0 }
 0x1e5   : > { %1343 = vmatmul.msk.f32.gmra.mxu0 %vm571_vm1, %v566_v15  ;;  %1359 = vmatmul.msk.f32.gmra.mxu1 %vm571_vm1, %v566_v15 }
 0x1ec   : > { %v567_v16 = vpop.trf.xlu0 }
 0x1ed   : > { %1344 = vmatmul.msk.f32.gmra.mxu0 %vm571_vm1, %v567_v16  ;;  %1360 = vmatmul.msk.f32.gmra.mxu1 %vm571_vm1, %v567_v16 }
 0x1f4   : > { %v568_v17 = vpop.trf.xlu0 }
 0x1f5   : > { %1345 = vmatmul.msk.f32.gmra.mxu0 %vm571_vm1, %v568_v17  ;;  %1361 = vmatmul.msk.f32.gmra.mxu1 %vm571_vm1, %v568_v17 }
 0x1fc   : > { %v569_v18 = vpop.trf.xlu0 }
 0x1fd   : > { %1346 = vmatmul.msk.f32.gmra.mxu0 %vm571_vm1, %v569_v18  ;;  %1362 = vmatmul.msk.f32.gmra.mxu1 %vm571_vm1, %v569_v18 }
 0x204   : > { %v570_v19 = vpop.trf.xlu0 }
 0x205   : > { %1347 = vmatmul.msk.f32.gmra.mxu0 %vm571_vm1, %v570_v19  ;;  %1363 = vmatmul.msk.f32.gmra.mxu1 %vm571_vm1, %v570_v19 }
 0x20a   : > { %v1946_v20 = vpop.f32.mrf.mxu0  ;;  %v1948_v21 = vpop.f32.mrf.mxu1 }
 0x20b   : > { %v750_v3 = vmax.f32 %v1946_v20, %v1948_v21 }
 0x212   : > { %v1950_v22 = vpop.f32.mrf.mxu0  ;;  %v1952_v23 = vpop.f32.mrf.mxu1 }
 0x213   : > { %v753_v0 = vmax.f32 %v1950_v22, %v1952_v23 }
 0x21a   : > { %v1954_v24 = vpop.f32.mrf.mxu0  ;;  %v1956_v25 = vpop.f32.mrf.mxu1 }
 0x21b   : > { %v756_v2 = vmax.f32 %v1954_v24, %v1956_v25 }
 0x222   : > { %v1958_v26 = vpop.f32.mrf.mxu0  ;;  %v1960_v27 = vpop.f32.mrf.mxu1 }
 0x223   : > { %v759_v59 = vmax.f32 %v1958_v26, %v1960_v27 }
 0x22a   : > { %v1962_v28 = vpop.f32.mrf.mxu0  ;;  %v1964_v29 = vpop.f32.mrf.mxu1 }
 0x22b   : > { %v762_v1 = vmax.f32 %v1962_v28, %v1964_v29 }
 0x232   : > { %v1966_v30 = vpop.f32.mrf.mxu0  ;;  %v1968_v31 = vpop.f32.mrf.mxu1 }
 0x233   : > { %v765_v47 = vmax.f32 %v1966_v30, %v1968_v31 }
 0x23a   : > { %v1970_v32 = vpop.f32.mrf.mxu0  ;;  %v1972_v33 = vpop.f32.mrf.mxu1 }
 0x23b   : > { %v768_v52 = vmax.f32 %v1970_v32, %v1972_v33 }
 0x242   : > { %v1974_v34 = vpop.f32.mrf.mxu0  ;;  %v1976_v35 = vpop.f32.mrf.mxu1 }
 0x243   : > { %v771_v43 = vmax.f32 %v1974_v34, %v1976_v35 }
 0x24a   : > { %v1978_v36 = vpop.f32.mrf.mxu0  ;;  %v1980_v37 = vpop.f32.mrf.mxu1 }
 0x24b   : > { %v774_v48 = vmax.f32 %v1978_v36, %v1980_v37 }
 0x252   : > { %v664_v38 = vpop.f32.mrf.mxu0  ;;  %v729_v39 = vpop.f32.mrf.mxu1 }
 0x253   : > { %v777_v40 = vmax.f32 %v664_v38, %v729_v39 }
 0x255   : > { %778 = vmax.xlane.f32.xlu2 %v777_v40 }
 0x25a   : > { %v1982_v41 = vpop.f32.mrf.mxu0  ;;  %v1984_v42 = vpop.f32.mrf.mxu1 }
 0x25b   : > { %v780_v44 = vmax.f32 %v1982_v41, %v1984_v42 }
 0x25d   : > { %772 = vmax.xlane.f32.xlu2 %v771_v43  ;;  %781 = vmax.xlane.f32.xlu1 %v780_v44 }
 0x262   : > { %v670_v45 = vpop.f32.mrf.mxu0  ;;  %v735_v46 = vpop.f32.mrf.mxu1 }
 0x263   : > { %v783_v49 = vmax.f32 %v670_v45, %v735_v46 }
 0x265   : > { %766 = vmax.xlane.f32.xlu2 %v765_v47  ;;  %775 = vmax.xlane.f32.xlu1 %v774_v48 }
 0x266   : > { %784 = vmax.xlane.f32.xlu0 %v783_v49 }
 0x26a   : > { %v1994_v50 = vpop.f32.mrf.mxu0  ;;  %v1996_v51 = vpop.f32.mrf.mxu1 }
 0x26b   : > { %v786_v53 = vmax.f32 %v1994_v50, %v1996_v51 }
 0x26d   : > { %769 = vmax.xlane.f32.xlu1 %v768_v52  ;;  %787 = vmax.xlane.f32.xlu2 %v786_v53 }
 0x272   : > { %v2002_v54 = vpop.f32.mrf.mxu0  ;;  %v2004_v55 = vpop.f32.mrf.mxu1 }
 0x273   : > { %v789_v56 = vmax.f32 %v2002_v54, %v2004_v55 }
 0x275   : > { %790 = vmax.xlane.f32.xlu2 %v789_v56 }
 0x27a   : > { %v2008_v57 = vpop.f32.mrf.mxu0  ;;  %v2010_v58 = vpop.f32.mrf.mxu1 }
 0x27b   : > { %v792_v60 = vmax.f32 %v2008_v57, %v2010_v58 }
 0x27d   : > { %760 = vmax.xlane.f32.xlu2 %v759_v59  ;;  %793 = vmax.xlane.f32.xlu1 %v792_v60 }
 0x282   : > { %v2016_v61 = vpop.f32.mrf.mxu0  ;;  %v2018_v62 = vpop.f32.mrf.mxu1 }
 0x283   : > { %v795_v63 = vmax.f32 %v2016_v61, %v2018_v62 }
 0x285   : > { %754 = vmax.xlane.f32.xlu2 %v753_v0  ;;  %796 = vmax.xlane.f32.xlu1 %v795_v63 }
 0x28d   : > { %763 = vmax.xlane.f32.xlu1 %v762_v1 }
 0x295   : > { %757 = vmax.xlane.f32.xlu1 %v756_v2 }
 0x29d   : > { %751 = vmax.xlane.f32.xlu1 %v750_v3 }
 0x2c8   : > { %v779_v4 = vpop.xlane.xlu2 %778 }
 0x2c9   : > { %v816_v5 = vsub.f32 %v664_v38, %v779_v4  ;;  %v817_v6 = vsub.f32 %v729_v39, %v779_v4 }
 0x2cb   : > { %v866_v7 = vmul.f32 1.442695, %v816_v5  ;;  %v868_v8 = vmul.f32 1.442695, %v817_v6 }
 0x2cd   : > { %1467 = vpow2.f32 %v866_v7 }
 0x2ce   : > { %1469 = vpow2.f32 %v868_v8 }
 0x2d0   : > { %v2030_v9 = vpop.xlane.xlu2 %772  ;;  %v782_v10 = vpop.xlane.xlu1 %781 }
 0x2d1   : > { %v818_v43 = vsub.f32 %v1982_v41, %v782_v10  ;;  %v819_v47 = vsub.f32 %v1984_v42, %v782_v10 }
 0x2d3   : > { %v2032_v11 = vpop.eup %1467  ;;  %v870_v52 = vmul.f32 1.442695, %v818_v43  ;;  %v872_v53 = vmul.f32 1.442695, %v819_v47 }
 0x2d4   : > { %v2034_v12 = vpop.eup %1469 }
 0x2d5   : > { %v921_v13 = vadd.f32 %v2034_v12, %v2032_v11 }
 0x2d7   : > { %922 = vadd.xlane.f32.xlu2 %v921_v13 }
 0x2d8   : > { %v2038_v14 = vpop.xlane.xlu2 %766  ;;  %v776_v15 = vpop.xlane.xlu1 %775 }
 0x2d9   : > { %v814_v16 = vsub.f32 %v1978_v36, %v776_v15  ;;  %v815_v17 = vsub.f32 %v1980_v37, %v776_v15  ;;  %v785_v18 = vpop.xlane.xlu0 %784 }
 0x2da   : > { %v820_v19 = vsub.f32 %v670_v45, %v785_v18  ;;  %v821_v38 = vsub.f32 %v735_v46, %v785_v18 }
 0x2db   : > { %v862_v39 = vmul.f32 1.442695, %v814_v16  ;;  %v864_v40 = vmul.f32 1.442695, %v815_v17 }
 0x2dc   : > { %v874_v44 = vmul.f32 1.442695, %v820_v19  ;;  %v876_v48 = vmul.f32 1.442695, %v821_v38 }
 0x2dd   : > { %1471 = vpow2.f32 %v862_v39 }
 0x2de   : > { %1473 = vpow2.f32 %v864_v40 }
 0x2df   : > { %1475 = vpow2.f32 %v874_v44 }
 0x2e0   : > { %v788_v49 = vpop.xlane.xlu2 %787  ;;  %1477 = vpow2.f32 %v876_v48  ;;  %v770_v60 = vpop.xlane.xlu1 %769 }
 0x2e1   : > { %v822_v36 = vsub.f32 %v1994_v50, %v788_v49  ;;  %v823_v37 = vsub.f32 %v1996_v51, %v788_v49  ;;  %1479 = vpow2.f32 %v870_v52  ;;  %v810_v18 = vsub.f32 %v1970_v32, %v770_v60 }
 0x2e2   : > { %1481 = vpow2.f32 %v872_v53  ;;  %v811_v38 = vsub.f32 %v1972_v33, %v770_v60  ;;  %v812_v32 = vsub.f32 %v1974_v34, %v2030_v9  ;;  %v813_v33 = vsub.f32 %v1976_v35, %v2030_v9 }
 0x2e3   : > { %v2046_v45 = vpop.eup %1471  ;;  %v878_v42 = vmul.f32 1.442695, %v822_v36  ;;  %v880_v63 = vmul.f32 1.442695, %v823_v37  ;;  %v854_v39 = vmul.f32 1.442695, %v810_v18  ;;  %v808_v37 = vsub.f32 %v1966_v30, %v2038_v14 }
 0x2e4   : > { %v2048_v46 = vpop.eup %1473  ;;  %v856_v44 = vmul.f32 1.442695, %v811_v38  ;;  %v858_v53 = vmul.f32 1.442695, %v812_v32 }
 0x2e5   : > { %v2050_v41 = vpop.eup %1475  ;;  %v918_v56 = vadd.f32 %v2048_v46, %v2046_v45  ;;  %1483 = vpow2.f32 %v878_v42 }
 0x2e6   : > { %v2054_v59 = vpop.eup %1477  ;;  %1485 = vpow2.f32 %v880_v63  ;;  %v809_v63 = vsub.f32 %v1968_v31, %v2038_v14 }
 0x2e7   : > { %919 = vadd.xlane.f32.xlu1 %v918_v56  ;;  %v927_v50 = vadd.f32 %v2054_v59, %v2050_v41  ;;  %v2060_v2 = vpop.eup %1479 }
 0x2e8   : > { %v791_v0 = vpop.xlane.xlu2 %790  ;;  %v2062_v5 = vpop.eup %1481 }
 0x2e9   : > { %v824_v51 = vsub.f32 %v2002_v54, %v791_v0  ;;  %v825_v1 = vsub.f32 %v2004_v55, %v791_v0  ;;  %928 = vadd.xlane.f32.xlu2 %v927_v50  ;;  %v924_v6 = vadd.f32 %v2062_v5, %v2060_v2 }
 0x2eb   : > { %v882_v3 = vmul.f32 1.442695, %v824_v51  ;;  %v884_v4 = vmul.f32 1.442695, %v825_v1  ;;  %v2066_v8 = vpop.eup %1483  ;;  %v852_v51 = vmul.f32 1.442695, %v809_v63 }
 0x2ec   : > { %v2070_v10 = vpop.eup %1485 }
 0x2ed   : > { %1487 = vpow2.f32 %v882_v3 }
 0x2ee   : > { %1489 = vpow2.f32 %v884_v4 }
 0x2ef   : > { %925 = vadd.xlane.f32.xlu1 %v924_v6 }
 0x2f0   : > { %v794_v7 = vpop.xlane.xlu1 %793  ;;  %v761_v1 = vpop.xlane.xlu2 %760 }
 0x2f1   : > { %v826_v54 = vsub.f32 %v2008_v57, %v794_v7  ;;  %v827_v55 = vsub.f32 %v2010_v58, %v794_v7  ;;  %v930_v57 = vadd.f32 %v2070_v10, %v2066_v8  ;;  %v805_v18 = vsub.f32 %v1960_v27, %v761_v1 }
 0x2f3   : > { %v2072_v13 = vpop.eup %1487  ;;  %v886_v15 = vmul.f32 1.442695, %v826_v54  ;;  %v888_v17 = vmul.f32 1.442695, %v827_v55  ;;  %v804_v54 = vsub.f32 %v1958_v26, %v761_v1  ;;  %v844_v38 = vmul.f32 1.442695, %v805_v18 }
 0x2f4   : > { %v2074_v16 = vpop.eup %1489 }
 0x2f5   : > { %v933_v19 = vadd.f32 %v2074_v16, %v2072_v13  ;;  %1491 = vpow2.f32 %v886_v15 }
 0x2f6   : > { %1493 = vpow2.f32 %v888_v17 }
 0x2f7   : > { %934 = vadd.xlane.f32.xlu2 %v933_v19  ;;  %931 = vadd.xlane.f32.xlu1 %v930_v57  ;;  %1495 = vpow2.f32 %v854_v39 }
 0x2f8   : > { %v797_v58 = vpop.xlane.xlu1 %796  ;;  %1497 = vpow2.f32 %v856_v44 }
 0x2f9   : > { %v828_v40 = vsub.f32 %v2016_v61, %v797_v58  ;;  %v829_v43 = vsub.f32 %v2018_v62, %v797_v58  ;;  %v860_v62 = vmul.f32 1.442695, %v813_v33 }
 0x2fb   : > { %v890_v47 = vmul.f32 1.442695, %v828_v40  ;;  %v892_v48 = vmul.f32 1.442695, %v829_v43  ;;  %v2088_v49 = vpop.eup %1491  ;;  %v755_v40 = vpop.xlane.xlu2 %754 }
 0x2fc   : > { %v2090_v52 = vpop.eup %1493  ;;  %v800_v33 = vsub.f32 %v1950_v22, %v755_v40 }
 0x2fd   : > { %1499 = vpow2.f32 %v890_v47  ;;  %v936_v61 = vadd.f32 %v2090_v52, %v2088_v49  ;;  %v2096_v9 = vpop.eup %1495 }
 0x2fe   : > { %1501 = vpow2.f32 %v892_v48  ;;  %v2100_v60 = vpop.eup %1497 }
 0x2ff   : > { %937 = vadd.xlane.f32.xlu1 %v936_v61  ;;  %1503 = vpow2.f32 %v858_v53  ;;  %v912_v50 = vadd.f32 %v2100_v60, %v2096_v9  ;;  %v834_v61 = vmul.f32 1.442695, %v800_v33 }
 0x300   : > { %v764_v36 = vpop.xlane.xlu1 %763  ;;  %1505 = vpow2.f32 %v860_v62 }
 0x301   : > { %v806_v34 = vsub.f32 %v1962_v28, %v764_v36  ;;  %v807_v35 = vsub.f32 %v1964_v29, %v764_v36  ;;  %v850_v29 = vmul.f32 1.442695, %v808_v37 }
 0x303   : > { %v846_v42 = vmul.f32 1.442695, %v806_v34  ;;  %v848_v56 = vmul.f32 1.442695, %v807_v35  ;;  %v2104_v0 = vpop.eup %1499 }
 0x304   : > { %v2106_v28 = vpop.eup %1501 }
 0x305   : > { %1507 = vpow2.f32 %v846_v42  ;;  %v939_v30 = vadd.f32 %v2106_v28, %v2104_v0  ;;  %v2112_v4 = vpop.eup %1503 }
 0x306   : > { %1509 = vpow2.f32 %v848_v56  ;;  %v2116_v6 = vpop.eup %1505 }
 0x307   : > { %913 = vadd.xlane.f32.xlu1 %v912_v50  ;;  %940 = vadd.xlane.f32.xlu2 %v939_v30  ;;  %1511 = vpow2.f32 %v850_v29  ;;  %v915_v19 = vadd.f32 %v2116_v6, %v2112_v4 }
 0x308   : > { %v758_v3 = vpop.xlane.xlu1 %757  ;;  %1513 = vpow2.f32 %v852_v51 }
 0x309   : > { %v802_v31 = vsub.f32 %v1954_v24, %v758_v3  ;;  %v803_v14 = vsub.f32 %v1956_v25, %v758_v3  ;;  %v842_v25 = vmul.f32 1.442695, %v804_v54 }
 0x30b   : > { %v2118_v7 = vpop.eup %1507  ;;  %v838_v55 = vmul.f32 1.442695, %v802_v31  ;;  %v840_v15 = vmul.f32 1.442695, %v803_v14 }
 0x30c   : > { %v2121_v17 = vpop.eup %1509 }
 0x30d   : > { %1515 = vpow2.f32 %v838_v55  ;;  %v906_v24 = vadd.f32 %v2121_v17, %v2118_v7  ;;  %v2128_v58 = vpop.eup %1511 }
 0x30e   : > { %1517 = vpow2.f32 %v840_v15  ;;  %v2132_v27 = vpop.eup %1513 }
 0x30f   : > { %907 = vadd.xlane.f32.xlu1 %v906_v24  ;;  %916 = vadd.xlane.f32.xlu2 %v915_v19  ;;  %1519 = vpow2.f32 %v842_v25 }
 0x310   : > { %v752_v57 = vpop.xlane.xlu1 %751  ;;  %1521 = vpow2.f32 %v844_v38 }
 0x311   : > { %v798_v26 = vsub.f32 %v1946_v20, %v752_v57  ;;  %v799_v39 = vsub.f32 %v1948_v21, %v752_v57  ;;  %v801_v20 = vsub.f32 %v1952_v23, %v755_v40  ;;  %v909_v21 = vadd.f32 %v2132_v27, %v2128_v58 }
 0x313   : > { %v2134_v43 = vpop.eup %1515  ;;  %v830_v44 = vmul.f32 1.442695, %v798_v26  ;;  %v832_v32 = vmul.f32 1.442695, %v799_v39  ;;  %v836_v36 = vmul.f32 1.442695, %v801_v20 }
 0x314   : > { %v2136_v47 = vpop.eup %1517 }
 0x315   : > { %1523 = vpow2.f32 %v830_v44  ;;  %v900_v48 = vadd.f32 %v2136_v47, %v2134_v43  ;;  %v2144_v53 = vpop.eup %1519 }
 0x316   : > { %1525 = vpow2.f32 %v832_v32  ;;  %v2146_v62 = vpop.eup %1521 }
 0x317   : > { %901 = vadd.xlane.f32.xlu1 %v900_v48  ;;  %910 = vadd.xlane.f32.xlu2 %v909_v21  ;;  %1527 = vpow2.f32 %v834_v61  ;;  %v903_v35 = vadd.f32 %v2146_v62, %v2144_v53 }
 0x318   : > { %1529 = vpow2.f32 %v836_v36 }
 0x31b   : > { %v2148_v34 = vpop.eup %1523 }
 0x31c   : > { %v2150_v22 = vpop.eup %1525 }
 0x31d   : > { %v894_v23 = vadd.f32 %v2150_v22, %v2148_v34  ;;  %v2156_v37 = vpop.eup %1527 }
 0x31e   : > { %v2158_v42 = vpop.eup %1529 }
 0x31f   : > { %895 = vadd.xlane.f32.xlu1 %v894_v23  ;;  %904 = vadd.xlane.f32.xlu2 %v903_v35  ;;  %v897_v56 = vadd.f32 %v2158_v42, %v2156_v37 }
 0x327   : > { %898 = vadd.xlane.f32.xlu2 %v897_v56 }
 0x34a   : > { %v923_v29 = vpop.xlane.xlu2 %922 }
 0x35a   : > { %v920_v63 = vpop.xlane.xlu1 %919 }
 0x35c   : > { %v929_v30 = vpop.xlane.xlu2 %928 }
 0x362   : > { %v926_v50 = vpop.xlane.xlu1 %925 }
 0x36a   : > { %v932_v51 = vpop.xlane.xlu1 %931  ;;  %v935_v1 = vpop.xlane.xlu2 %934 }
 0x372   : > { %v938_v3 = vpop.xlane.xlu1 %937 }
 0x373   : > { %1531 = vrcp.f32 %v938_v3  ;;  %v537_v3 = vld [vmem:[%s1910_s9 + $0xa0] sm:$0xff] }
 0x379   : > { %v1532_v54 = vpop.eup %1531 }
 0x37a   : > { %v914_v31 = vpop.xlane.xlu1 %913  ;;  %v941_v14 = vpop.xlane.xlu2 %940  ;;  %v986_v38 = vmul.f32 %v1532_v54, %v2088_v49  ;;  %v987_v57 = vmul.f32 %v1532_v54, %v2090_v52  ;;  %v991_v54 = vld [vmem:[#allocation3] sm:$0xff] }
 0x37b   : > { %1533 = vrcp.f32 %v941_v14  ;;  %v990_v14 = vld [vmem:[#allocation3 + $0x30] sm:$0xff] }
 0x37c   : > { %1535 = vrcp.f32 %v935_v1 }
 0x37d   : > { %1537 = vrcp.f32 %v932_v51 }
 0x37e   : > { %1539 = vrcp.f32 %v929_v30 }
 0x37f   : > { %1541 = vrcp.f32 %v926_v50 }
 0x380   : > { %1543 = vrcp.f32 %v923_v29 }
 0x381   : > { %v1534_v55 = vpop.eup %1533  ;;  %1545 = vrcp.f32 %v920_v63 }
 0x382   : > { %v917_v15 = vpop.xlane.xlu2 %916  ;;  %v908_v18 = vpop.xlane.xlu1 %907  ;;  %v988_v24 = vmul.f32 %v1534_v55, %v2104_v0  ;;  %v989_v25 = vmul.f32 %v1534_v55, %v2106_v28 }
 0x383   : > { %v1536_v19 = vpop.eup %1535  ;;  %1547 = vrcp.f32 %v917_v15 }
 0x384   : > { %1006 = vmatpush.msra.mxu2 %v988_v24  ;;  %1047 = vmatpush.msra.mxu3 %v989_v25  ;;  %v1538_v26 = vpop.eup %1537  ;;  %v984_v39 = vmul.f32 %v1536_v19, %v2072_v13  ;;  %v985_v40 = vmul.f32 %v1536_v19, %v2074_v16  ;;  %1549 = vrcp.f32 %v914_v31  ;;  %v538_v31 = vld [vmem:[%s1910_s9 + $0xb0] sm:$0xff]  ;;  %v992_v25 = vld [vmem:[#allocation3 + $0x58] sm:$0xff] }
 0x385   : > { %v1540_v44 = vpop.eup %1539  ;;  %v982_v0 = vmul.f32 %v1538_v26, %v2066_v8  ;;  %v983_v28 = vmul.f32 %v1538_v26, %v2070_v10  ;;  %v993_v19 = vld [vmem:[#allocation3 + $0x18] sm:$0xff] }
 0x386   : > { %1007 = vmatpush.msra.mxu2 %v986_v38  ;;  %1048 = vmatpush.msra.mxu3 %v987_v57  ;;  %v1542_v32 = vpop.eup %1541  ;;  %v980_v52 = vmul.f32 %v1540_v44, %v2050_v41  ;;  %v981_v33 = vmul.f32 %v1540_v44, %v2054_v59  ;;  %v995_v44 = vld [vmem:[#allocation3 + $0x68] sm:$0xff] }
 0x387   : > { %v1544_v13 = vpop.eup %1543  ;;  %v978_v48 = vmul.f32 %v1542_v32, %v2060_v2  ;;  %v979_v8 = vmul.f32 %v1542_v32, %v2062_v5 }
 0x388   : > { %1008 = vmatpush.msra.mxu2 %v984_v39  ;;  %1049 = vmatpush.msra.mxu3 %v985_v40  ;;  %v1546_v20 = vpop.eup %1545  ;;  %v976_v10 = vmul.f32 %v1544_v13, %v2032_v11  ;;  %v977_v21 = vmul.f32 %v1544_v13, %v2034_v12  ;;  %v994_v40 = vld [vmem:[#allocation3 + $0x50] sm:$0xff] }
 0x389   : > { %v1548_v41 = vpop.eup %1547  ;;  %v974_v59 = vmul.f32 %v1546_v20, %v2046_v45  ;;  %v975_v61 = vmul.f32 %v1546_v20, %v2048_v46  ;;  %v998_v20 = vld [vmem:[#allocation3 + $0x40] sm:$0xff] }
 0x38a   : > { %v911_v49 = vpop.xlane.xlu2 %910  ;;  %1009 = vmatpush.msra.mxu2 %v982_v0  ;;  %1050 = vmatpush.msra.mxu3 %v983_v28  ;;  %v902_v16 = vpop.xlane.xlu1 %901  ;;  %v972_v5 = vmul.f32 %v1548_v41, %v2112_v4  ;;  %v973_v23 = vmul.f32 %v1548_v41, %v2116_v6 }
 0x38b   : > { %1551 = vrcp.f32 %v911_v49  ;;  %v1550_v36 = vpop.eup %1549 }
 0x38c   : > { %1010 = vmatpush.msra.mxu2 %v980_v52  ;;  %1051 = vmatpush.msra.mxu3 %v981_v33  ;;  %1553 = vrcp.f32 %v908_v18  ;;  %v970_v12 = vmul.f32 %v1550_v36, %v2096_v9  ;;  %v971_v35 = vmul.f32 %v1550_v36, %v2100_v60  ;;  %v996_v52 = vld [vmem:[#allocation3 + $0x8] sm:$0xff]  ;;  %v1000_v36 = vld [vmem:[#allocation3 + $0x10] sm:$0xff] }
 0x38d   : > { %1555 = vrcp.f32 %v902_v16  ;;  %v997_v33 = vld [vmem:[#allocation3 + $0x48] sm:$0xff] }
 0x38e   : > { %1011 = vmatpush.msra.mxu2 %v978_v48  ;;  %1052 = vmatpush.msra.mxu3 %v979_v8 }
 0x390   : > { %1012 = vmatpush.msra.mxu2 %v976_v10  ;;  %1053 = vmatpush.msra.mxu3 %v977_v21  ;;  %v999_v10 = vld [vmem:[#allocation3 + $0x20] sm:$0xff] }
 0x391   : > { %v1552_v11 = vpop.eup %1551 }
 0x392   : > { %v905_v2 = vpop.xlane.xlu2 %904  ;;  %1013 = vmatpush.msra.mxu2 %v974_v59  ;;  %1054 = vmatpush.msra.mxu3 %v975_v61  ;;  %v1554_v45 = vpop.eup %1553  ;;  %v968_v46 = vmul.f32 %v1552_v11, %v2128_v58  ;;  %v969_v63 = vmul.f32 %v1552_v11, %v2132_v27 }
 0x393   : > { %1557 = vrcp.f32 %v905_v2  ;;  %v896_v56 = vpop.xlane.xlu1 %895  ;;  %v1556_v29 = vpop.eup %1555  ;;  %v966_v4 = vmul.f32 %v1554_v45, %v2118_v7  ;;  %v967_v6 = vmul.f32 %v1554_v45, %v2121_v17  ;;  %v1001_v2 = vld [vmem:[#allocation3 + $0x38] sm:$0xff]  ;;  %v1003_v45 = vld [vmem:[#allocation3 + $0x70] sm:$0xff] }
 0x394   : > { %1014 = vmatpush.msra.mxu2 %v972_v5  ;;  %1055 = vmatpush.msra.mxu3 %v973_v23  ;;  %1559 = vrcp.f32 %v896_v56  ;;  %v962_v27 = vmul.f32 %v1556_v29, %v2134_v43  ;;  %v963_v30 = vmul.f32 %v1556_v29, %v2136_v47  ;;  %v532_v47 = vld [vmem:[%s1910_s9 + $0x50] sm:$0xff] }
 0x396   : > { %1015 = vmatpush.msra.mxu2 %v970_v12  ;;  %1056 = vmatpush.msra.mxu3 %v971_v35  ;;  %v1002_v35 = vld [vmem:[#allocation3 + $0x60] sm:$0xff] }
 0x398   : > { %1016 = vmatpush.msra.mxu2 %v968_v46  ;;  %1057 = vmatpush.msra.mxu3 %v969_v63 }
 0x399   : > { %v1558_v50 = vpop.eup %1557 }
 0x39a   : > { %v899_v9 = vpop.xlane.xlu2 %898  ;;  %1017 = vmatpush.msra.mxu2 %v966_v4  ;;  %1058 = vmatpush.msra.mxu3 %v967_v6  ;;  %v964_v60 = vmul.f32 %v1558_v50, %v2144_v53  ;;  %v965_v58 = vmul.f32 %v1558_v50, %v2146_v62  ;;  %v1560_v7 = vpop.eup %1559  ;;  %v531_v62 = vld [vmem:[%s1910_s9 + $0x40] sm:$0xff]  ;;  %v1004_v4 = vld [vmem:[#allocation3 + $0x78] sm:$0xff]  ;;  %v1005_v6 = vld [vmem:[#allocation3 + $0x28] sm:$0xff] }
 0x39b   : > { %1561 = vrcp.f32 %v899_v9  ;;  %v958_v53 = vmul.f32 %v1560_v7, %v2148_v34  ;;  %v959_v43 = vmul.f32 %v1560_v7, %v2150_v22  ;;  %v535_v34 = vld [vmem:[%s1910_s9 + $0x80] sm:$0xff]  ;;  %v536_v22 = vld [vmem:[%s1910_s9 + $0x90] sm:$0xff] }
 0x39c   : > { %1018 = vmatpush.msra.mxu2 %v964_v60  ;;  %1059 = vmatpush.msra.mxu3 %v965_v58 }
 0x39e   : > { %1019 = vmatpush.msra.mxu2 %v962_v27  ;;  %1060 = vmatpush.msra.mxu3 %v963_v30 }
 0x3a1   : > { %v1562_v17 = vpop.eup %1561 }
 0x3a2   : > { %v960_v51 = vmul.f32 %v1562_v17, %v2156_v37  ;;  %v961_v1 = vmul.f32 %v1562_v17, %v2158_v42  ;;  %v533_v37 = vld [vmem:[%s1910_s9 + $0x60] sm:$0xff]  ;;  %v534_v42 = vld [vmem:[%s1910_s9 + $0x70] sm:$0xff] }
 0x3a4   : > { %1020 = vmatpush.msra.mxu2 %v960_v51  ;;  %1061 = vmatpush.msra.mxu3 %v961_v1 }
 0x3a6   : > { %1021 = vmatpush.msra.mxu2 %v958_v53  ;;  %1062 = vmatpush.msra.mxu3 %v959_v43 }
 0x3a7   : > { %1022 = vmatmul.f32.vlgmr.msra.gmra.mxu2 %v531_v62  ;;  %1063 = vmatmul.f32.vlgmr.msra.gmra.mxu3 %v531_v62 }
 0x3af   : > { %1025 = vmatmul.f32.gmra.mxu2 %v532_v47  ;;  %1066 = vmatmul.f32.gmra.mxu3 %v532_v47 }
 0x3b7   : > { %1028 = vmatmul.f32.gmra.mxu2 %v533_v37  ;;  %1069 = vmatmul.f32.gmra.mxu3 %v533_v37 }
 0x3bf   : > { %1031 = vmatmul.f32.gmra.mxu2 %v534_v42  ;;  %1072 = vmatmul.f32.gmra.mxu3 %v534_v42 }
 0x3c7   : > { %1034 = vmatmul.f32.gmra.mxu2 %v535_v34  ;;  %1075 = vmatmul.f32.gmra.mxu3 %v535_v34 }
 0x3cf   : > { %1037 = vmatmul.f32.gmra.mxu2 %v536_v22  ;;  %1078 = vmatmul.f32.gmra.mxu3 %v536_v22 }
 0x3d7   : > { %1040 = vmatmul.f32.gmra.mxu2 %v537_v3  ;;  %1081 = vmatmul.f32.gmra.mxu3 %v537_v3 }
 0x3df   : > { %1043 = vmatmul.f32.gmra.mxu2 %v538_v31  ;;  %1084 = vmatmul.f32.gmra.mxu3 %v538_v31 }
 0x42a   : > { %v1023_v55 = vpop.f32.mrf.mxu2  ;;  %v1064_v15 = vpop.f32.mrf.mxu3 }
 0x42b   : > { %v1088_v18 = vadd.f32 %v1023_v55, %v990_v14  ;;  %v1089_v24 = vadd.f32 %v1064_v15, %v991_v54 }
 0x42d   : > { %1104 = vst [vmem:[#allocation3 + $0x30] sm:$0xff] %v1088_v18 }
 0x42e   : > { %1105 = vst [vmem:[#allocation3] sm:$0xff] %v1089_v24 }
 0x432   : > { %v1026_v38 = vpop.f32.mrf.mxu2  ;;  %v1067_v57 = vpop.f32.mrf.mxu3 }
 0x433   : > { %v1090_v26 = vadd.f32 %v1026_v38, %v992_v25  ;;  %v1091_v39 = vadd.f32 %v1067_v57, %v993_v19 }
 0x435   : > { %1106 = vst [vmem:[#allocation3 + $0x58] sm:$0xff] %v1090_v26 }
 0x436   : > { %1107 = vst [vmem:[#allocation3 + $0x18] sm:$0xff] %v1091_v39 }
 0x43a   : > { %v1029_v0 = vpop.f32.mrf.mxu2  ;;  %v1070_v28 = vpop.f32.mrf.mxu3 }
 0x43b   : > { %v1092_v32 = vadd.f32 %v1029_v0, %v994_v40  ;;  %v1093_v49 = vadd.f32 %v1070_v28, %v995_v44 }
 0x43d   : > { %1108 = vst [vmem:[#allocation3 + $0x50] sm:$0xff] %v1092_v32 }
 0x43e   : > { %1109 = vst [vmem:[#allocation3 + $0x68] sm:$0xff] %v1093_v49 }
 0x442   : > { %v1032_v13 = vpop.f32.mrf.mxu2  ;;  %v1073_v16 = vpop.f32.mrf.mxu3 }
 0x443   : > { %v1094_v48 = vadd.f32 %v1032_v13, %v996_v52  ;;  %v1095_v8 = vadd.f32 %v1073_v16, %v997_v33 }
 0x445   : > { %1110 = vst [vmem:[#allocation3 + $0x8] sm:$0xff] %v1094_v48 }
 0x446   : > { %1111 = vst [vmem:[#allocation3 + $0x48] sm:$0xff] %v1095_v8 }
 0x44a   : > { %v1035_v21 = vpop.f32.mrf.mxu2  ;;  %v1076_v41 = vpop.f32.mrf.mxu3 }
 0x44b   : > { %v1096_v59 = vadd.f32 %v1035_v21, %v998_v20  ;;  %v1097_v61 = vadd.f32 %v1076_v41, %v999_v10 }
 0x44d   : > { %1112 = vst [vmem:[#allocation3 + $0x40] sm:$0xff] %v1096_v59 }
 0x44e   : > { %1113 = vst [vmem:[#allocation3 + $0x20] sm:$0xff] %v1097_v61 }
 0x452   : > { %v1038_v5 = vpop.f32.mrf.mxu2  ;;  %v1079_v23 = vpop.f32.mrf.mxu3 }
 0x453   : > { %v1098_v11 = vadd.f32 %v1038_v5, %v1000_v36  ;;  %v1099_v12 = vadd.f32 %v1079_v23, %v1001_v2 }
 0x455   : > { %1114 = vst [vmem:[#allocation3 + $0x10] sm:$0xff] %v1098_v11 }
 0x456   : > { %1115 = vst [vmem:[#allocation3 + $0x38] sm:$0xff] %v1099_v12 }
 0x45a   : > { %v1041_v56 = vpop.f32.mrf.mxu2  ;;  %v1082_v46 = vpop.f32.mrf.mxu3 }
 0x45b   : > { %v1100_v63 = vadd.f32 %v1041_v56, %v1002_v35  ;;  %v1101_v29 = vadd.f32 %v1082_v46, %v1003_v45 }
 0x45d   : > { %1116 = vst [vmem:[#allocation3 + $0x60] sm:$0xff] %v1100_v63 }
 0x45e   : > { %1117 = vst [vmem:[#allocation3 + $0x70] sm:$0xff] %v1101_v29 }
 0x462   : > { %v1044_v50 = vpop.f32.mrf.mxu2  ;;  %v1085_v9 = vpop.f32.mrf.mxu3  ;;  %1123 = sbr.rel (%p1364_p0) target bundleno = 1148 (0x47c), region = 44 }
 0x463   : > { %v1102_v60 = vadd.f32 %v1044_v50, %v1004_v4  ;;  %v1103_v58 = vadd.f32 %v1085_v9, %v1005_v6 }
 0x465   : > { %1118 = vst [vmem:[#allocation3 + $0x78] sm:$0xff] %v1102_v60 }
 0x466   : > { %1119 = vst [vmem:[#allocation3 + $0x28] sm:$0xff] %v1103_v58 }
 0x467   : > { %v1125_v27 = vld [vmem:[#allocation3 + $0x30] sm:$0xff]  ;;  %v1126_v30 = vld [vmem:[#allocation3] sm:$0xff]  ;;  %v1127_v7 = vld [vmem:[#allocation3 + $0x58] sm:$0xff]  ;;  %v1141_v43 = vstv %s1124_s10 }
 0x468   : > { %v1128_v17 = vld [vmem:[#allocation3 + $0x18] sm:$0xff]  ;;  %v1158_v51 = vld [vmem:[%s1768_s13] sm:$0xff]  ;;  %v1129_v1 = vld [vmem:[#allocation3 + $0x50] sm:$0xff]  ;;  %v1142_v42 = vmul.f32 %v1141_v43, %v1125_v27  ;;  %v1143_v34 = vmul.f32 %v1141_v43, %v1126_v30  ;;  %v1144_v22 = vmul.f32 %v1141_v43, %v1127_v7 }
 0x469   : > { %v1130_v53 = vld [vmem:[#allocation3 + $0x68] sm:$0xff]  ;;  %v1160_v47 = vld [vmem:[%s1768_s13 + $0x10] sm:$0xff]  ;;  %v1145_v3 = vmul.f32 %v1141_v43, %v1128_v17  ;;  %v1161_v31 = vld [vmem:[%s1768_s13 + $0x18] sm:$0xff]  ;;  %v1146_v54 = vmul.f32 %v1141_v43, %v1129_v1 }
 0x46a   : > { %v1159_v62 = vld [vmem:[%s1768_s13 + $0x8] sm:$0xff]  ;;  %v1162_v55 = vld [vmem:[%s1768_s13 + $0x20] sm:$0xff]  ;;  %v1147_v15 = vmul.f32 %v1141_v43, %v1130_v53  ;;  %v1174_v24 = vadd.f32 %v1158_v51, %v1142_v42  ;;  %v1176_v19 = vadd.f32 %v1160_v47, %v1144_v22  ;;  %v1164_v40 = vld [vmem:[%s1768_s13 + $0x30] sm:$0xff] }
 0x46b   : > { %v1131_v37 = vld [vmem:[#allocation3 + $0x8] sm:$0xff]  ;;  %v1133_v18 = vld [vmem:[#allocation3 + $0x40] sm:$0xff]  ;;  %v1175_v25 = vadd.f32 %v1159_v62, %v1143_v34  ;;  %v1177_v39 = vadd.f32 %v1161_v31, %v1145_v3  ;;  %v1135_v0 = vld [vmem:[#allocation3 + $0x10] sm:$0xff]  ;;  %v1178_v28 = vadd.f32 %v1162_v55, %v1146_v54 }
 0x46c   : > { %v1132_v14 = vld [vmem:[#allocation3 + $0x48] sm:$0xff]  ;;  %v1148_v57 = vmul.f32 %v1141_v43, %v1131_v37  ;;  %v1134_v26 = vld [vmem:[#allocation3 + $0x20] sm:$0xff]  ;;  %1190 = vst [vmem:[%s1770_s14] sm:$0xff] %v1174_v24  ;;  %v1165_v32 = vld [vmem:[%s1768_s13 + $0x38] sm:$0xff]  ;;  %v1150_v49 = vmul.f32 %v1141_v43, %v1133_v18  ;;  %v1152_v10 = vmul.f32 %v1141_v43, %v1135_v0 }
 0x46d   : > { %v1163_v38 = vld [vmem:[%s1768_s13 + $0x28] sm:$0xff]  ;;  %v1149_v44 = vmul.f32 %v1141_v43, %v1132_v14  ;;  %v1136_v52 = vld [vmem:[#allocation3 + $0x38] sm:$0xff]  ;;  %1191 = vst [vmem:[%s1770_s14 + $0x8] sm:$0xff] %v1175_v25  ;;  %v1166_v13 = vld [vmem:[%s1768_s13 + $0x40] sm:$0xff]  ;;  %v1151_v16 = vmul.f32 %v1141_v43, %v1134_v26 }
 0x46e   : > { %v1179_v33 = vadd.f32 %v1163_v38, %v1147_v15  ;;  %v1137_v48 = vld [vmem:[#allocation3 + $0x60] sm:$0xff]  ;;  %1192 = vst [vmem:[%s1770_s14 + $0x10] sm:$0xff] %v1176_v19  ;;  %v1180_v8 = vadd.f32 %v1164_v40, %v1148_v57  ;;  %v1167_v20 = vld [vmem:[%s1768_s13 + $0x48] sm:$0xff]  ;;  %v1138_v21 = vld [vmem:[#allocation3 + $0x70] sm:$0xff]  ;;  %v1153_v61 = vmul.f32 %v1141_v43, %v1136_v52  ;;  %v1182_v2 = vadd.f32 %v1166_v13, %v1150_v49 }
 0x46f   : > { %1193 = vst [vmem:[%s1770_s14 + $0x18] sm:$0xff] %v1177_v39  ;;  %v1181_v41 = vadd.f32 %v1165_v32, %v1149_v44  ;;  %v1168_v59 = vld [vmem:[%s1768_s13 + $0x50] sm:$0xff]  ;;  %v1139_v36 = vld [vmem:[#allocation3 + $0x78] sm:$0xff]  ;;  %v1154_v23 = vmul.f32 %v1141_v43, %v1137_v48  ;;  %v1140_v11 = vld [vmem:[#allocation3 + $0x28] sm:$0xff]  ;;  %v1183_v12 = vadd.f32 %v1167_v20, %v1151_v16  ;;  %v1155_v45 = vmul.f32 %v1141_v43, %v1138_v21 }
 0x470   : > { %1194 = vst [vmem:[%s1770_s14 + $0x20] sm:$0xff] %v1178_v28  ;;  %v1169_v5 = vld [vmem:[%s1768_s13 + $0x58] sm:$0xff]  ;;  %v1170_v35 = vld [vmem:[%s1768_s13 + $0x60] sm:$0xff]  ;;  %v1184_v56 = vadd.f32 %v1168_v59, %v1152_v10  ;;  %v1171_v46 = vld [vmem:[%s1768_s13 + $0x68] sm:$0xff]  ;;  %v1156_v63 = vmul.f32 %v1141_v43, %v1139_v36  ;;  %v1157_v6 = vmul.f32 %v1141_v43, %v1140_v11 }
 0x471   : > { %1195 = vst [vmem:[%s1770_s14 + $0x28] sm:$0xff] %v1179_v33  ;;  %v1185_v29 = vadd.f32 %v1169_v5, %v1153_v61  ;;  %v1172_v4 = vld [vmem:[%s1768_s13 + $0x70] sm:$0xff]  ;;  %v1186_v50 = vadd.f32 %v1170_v35, %v1154_v23  ;;  %v1173_v9 = vld [vmem:[%s1768_s13 + $0x78] sm:$0xff]  ;;  %v1187_v60 = vadd.f32 %v1171_v46, %v1155_v45 }
 0x472   : > { %1196 = vst [vmem:[%s1770_s14 + $0x30] sm:$0xff] %v1180_v8  ;;  %v1188_v58 = vadd.f32 %v1172_v4, %v1156_v63  ;;  %v1189_v27 = vadd.f32 %v1173_v9, %v1157_v6 }
 0x473   : > { %1197 = vst [vmem:[%s1770_s14 + $0x38] sm:$0xff] %v1181_v41 }
 0x474   : > { %1198 = vst [vmem:[%s1770_s14 + $0x40] sm:$0xff] %v1182_v2 }
 0x475   : > { %1199 = vst [vmem:[%s1770_s14 + $0x48] sm:$0xff] %v1183_v12 }
 0x476   : > { %1200 = vst [vmem:[%s1770_s14 + $0x50] sm:$0xff] %v1184_v56 }
 0x477   : > { %1201 = vst [vmem:[%s1770_s14 + $0x58] sm:$0xff] %v1185_v29 }
 0x478   : > { %1202 = vst [vmem:[%s1770_s14 + $0x60] sm:$0xff] %v1186_v50 }
 0x479   : > { %1203 = vst [vmem:[%s1770_s14 + $0x68] sm:$0xff] %v1187_v60 }
 0x47a   : > { %1204 = vst [vmem:[%s1770_s14 + $0x70] sm:$0xff] %v1188_v58 }
 0x47b   : > { %1205 = vst [vmem:[%s1770_s14 + $0x78] sm:$0xff] %v1189_v27 }
 0x47c PF: > { %s1371_s20 = sshll.u32 %s1645_s21, 7  ;;  %s1219_s15 = sshll.u32 %s1770_s14, 4  ;;  %s1220_s15 = int_to_ptr.vmem [resolvable:$true] %s1219_s15 }
 0x47d   : > { %s1218_s13 = scalar_lea.hbm %s2284_s4, %s1371_s20  ;;  %s1207_s0 = scalar_lea.sflag [#allocation6], %s201_s7 }
 0x47e   : > { %s1221_s16 = sshll.u32 %s1218_s13, 4  ;;  %s1583_s21 = scalar_lea.hbm %s2284_s4, 256  ;;  %s1222_s16 = int_to_ptr.hbm [resolvable:$true] %s1221_s16 }
 0x47f   : > { %s1577_s25 = sshra.s32 %s1222_s16, 4  ;;  %s1578_s25 = int_to_ptr.hbm [resolvable:$true] %s1577_s25 }
 0x480   : > { %s1579_s30 = scalar_lea.hbm %s1578_s25, 128  ;;  %p1584_p5 = scmp.lt.s32.totalorder %s1578_s25, %s2284_s4 }
 0x481   : > { %p1580_p1 = scmp.ne.s32.totalorder %s1578_s25, %s1579_s30  ;;  %p1585_p6 = scmp.lt.s32.totalorder %s1583_s21, %s1579_s30 }
 0x483   : > { %p1581_p2 = pnand %p1580_p1, %p1740_p3  ;;  %p1586_p7 = por %p1585_p6, %p1584_p5 }
 0x485   : > { %p1582_p4 = pneg %p1581_p2 }
 0x487   : > { %p1587_p8 = pnand %p1586_p7, %p1582_p4 }
 0x489   : > { %1590 = shalt.err (!%p1587_p8)
}
 0x48a   : > { %s1661_s7 = smov 256   ;;  %s1662_s14 = smov 16  }
 0x48b   : > { %1388 = dma.vmem_to_hbm [thread:$0]  (%p1740_p3), %s1220_s15, 2048, %s1222_s16, %s1207_s0, %s1661_s7, %s1661_s7, %s1662_s14  }
 0x48c PF: > { %p1394_p10 = scmp.ge.s32.totalorder %s1657_s24, 2  ;;  %s1236_s20 = sand.u32 1, %s1629_s17  }
 0x48d   : > { %s1237_s11 = scalar_lea.sflag [#allocation6], %s1236_s20 }
 0x48e   : > { %p1391_p11 = pnand %p1394_p10, %p1750_p9 }
 0x490   : > { %p1392_p12 = pneg %p1391_p11 }
 0x492   : > { %1624 = dma.done.wait (%p1392_p12), %s1237_s11, 2048  }
 0x493   : > { %1626 = vsyncadd (%p1392_p12), %s1237_s11, 4294965248  ;;  %s18_s24 = sadd.s32 1, %s1657_s24   ;;  %s2287_s17 = smov %s1633_s18 }
 0x494   : > { %p15_p13 = scmp.ge.s32.totalorder %s18_s24, 6   ;;  %s2288_s18 = smov %s1637_s19 }
 0x495   : > { %s2289_s19 = smov %s1758_s6  ;;  %s2290_s20 = smov %s1649_s22 }
 0x496   : > { %s2291_s21 = smov %s1653_s23  ;;  %s2292_s22 = smov %s2295_s26 }
 0x497   : > { %s2293_s23 = smov %s2299_s27  ;;  %17 = sbr.rel (!%p15_p13) target bundleno = 7 (0x7), region = 80 }
 0x49c   :  { %1243 = vsyncpa [#allocation6], 1 }
 0x49d   :  { %1245 = vsyncpa [#allocation6 + $0x1], 1 }

</bundles_post_ra>
